<compile_context>
chip_gen: v7x
topology: tpu7x:2x2x1
jax: 0.10.0
libtpu: 0.0.40
codegen_flags: <defaults>
</compile_context>

<pallas_src>
import jax
import jax.numpy as jnp
from jax.experimental import pallas as pl
from jax.experimental.pallas import tpu as pltpu

EPS = 1e-6     # torch.nn.PairwiseDistance default eps
LANES = 128    # TPU lane width; per-batch scalar is broadcast across lanes in the output


def _hausdorff_kernel(res_ref, c1t_ref, c2_ref, out_ref):
    # res_ref : SMEM (1,) f32          scalar-prefetched resolution
    # c1t_ref : VMEM (BB, D, L1) f32   contour1, coordinate-major (points on lanes)
    # c2_ref  : VMEM (BB, L2, D) f32   contour2 (points on sublanes)
    # out_ref : VMEM (BB, 128) f32     Hausdorff value per batch element, bcast over lanes
    res = res_ref[0]
    BB, D, L1 = c1t_ref.shape
    L2 = c2_ref.shape[1]

    for i in range(BB):                               # static unroll over the batch block
        c1 = c1t_ref[i].astype(jnp.float32)           # (D, L1)
        c2 = c2_ref[i].astype(jnp.float32)            # (L2, D)

        # Per coordinate k:  d21[j, i] = c1_i[k] - c2_j[k] + eps
        d = (c1[0:1, :] + EPS) - c2[:, 0:1]           # (L2, L1)
        dsq21 = d * d
        s21 = d
        for k in range(1, D):                         # static, tiny (D == 2)
            d = (c1[k:k + 1, :] + EPS) - c2[:, k:k + 1]
            dsq21 = dsq21 + d * d
            s21 = s21 + d

        # d12_k = 2*eps - d21_k  =>  dsq12 = dsq21 - 4*eps*sum_k d21_k + 4*eps^2*D
        dsq12 = dsq21 - (4.0 * EPS) * s21 + (4.0 * EPS * EPS * D)

        # sup/inf on squared distances; sqrt only on the final scalar (monotone on >=0).
        hsq21 = jnp.max(jnp.min(dsq21, axis=1, keepdims=True), axis=0, keepdims=True)  # (1,1)
        hsq12 = jnp.max(jnp.min(dsq12, axis=0, keepdims=True), axis=1, keepdims=True)  # (1,1)
        h = jnp.sqrt(jnp.maximum(hsq21, hsq12)) * res                                  # (1,1)

        out_ref[i:i + 1, :] = jnp.broadcast_to(h, (1, out_ref.shape[1]))


def hausdorff_distance(contour1, contour2, resolution, *, block_b=8):
    """contour1: (B, L1, D), contour2: (B, L2, D), resolution: python float / scalar.
    Returns (B,) float32 symmetric Hausdorff distances scaled by resolution."""
    B, L1, D = contour1.shape
    _, L2, _ = contour2.shape
    BB = block_b
    B_pad = ((B + BB - 1) // BB) * BB

    c1t = jnp.transpose(contour1, (0, 2, 1)).astype(jnp.float32)   # (B, D, L1)
    c2 = contour2.astype(jnp.float32)                              # (B, L2, D)
    if B_pad != B:
        pad = B_pad - B
        c1t = jnp.pad(c1t, ((0, pad), (0, 0), (0, 0)))
        c2 = jnp.pad(c2, ((0, pad), (0, 0), (0, 0)))
    res = jnp.asarray([resolution], dtype=jnp.float32)

    grid_spec = pltpu.PrefetchScalarGridSpec(
        num_scalar_prefetch=1,
        grid=(B_pad // BB,),
        in_specs=[
            pl.BlockSpec((BB, D, L1), lambda g, res: (g, 0, 0)),
            pl.BlockSpec((BB, L2, D), lambda g, res: (g, 0, 0)),
        ],
        out_specs=pl.BlockSpec((BB, LANES), lambda g, res: (g, 0)),
    )
    out = pl.pallas_call(
        _hausdorff_kernel,
        out_shape=jax.ShapeDtypeStruct((B_pad, LANES), jnp.float32),
        grid_spec=grid_spec,
        compiler_params=pltpu.CompilerParams(
            dimension_semantics=("parallel",)),
    )(res, c1t, c2)
    return out[:B, 0]


def hausdorff_reference(c1, c2, resolution):
    """Pure-JAX reference matching the torch module exactly (direct formulation)."""
    d21 = jnp.sqrt(jnp.sum((c1[:, None, :, :] - c2[:, :, None, :] + EPS) ** 2, axis=-1))  # (B,L2,L1)
    d12 = jnp.sqrt(jnp.sum((c2[:, :, None, :] - c1[:, None, :, :] + EPS) ** 2, axis=-1))  # (B,L2,L1)
    h21 = jnp.max(jnp.min(d21, axis=2), axis=1)   # sup_{c2} inf_{c1}
    h12 = jnp.max(jnp.min(d12, axis=1), axis=1)   # sup_{c1} inf_{c2}
    return jnp.maximum(h12, h21) * resolution


if __name__ == "__main__":
    key = jax.random.PRNGKey(0)
    k1, k2 = jax.random.split(key)
    B, L1, L2, D = 2, 128, 64, 2
    contour1 = jax.random.uniform(k1, (B, L1, D), dtype=jnp.float32) * 10.0
    contour2 = jax.random.uniform(k2, (B, L2, D), dtype=jnp.float32) * 10.0
    resolution = 0.5

    out = jax.block_until_ready(hausdorff_distance(contour1, contour2, resolution))
    ref = hausdorff_reference(contour1, contour2, resolution)

    assert out.shape == (B,)
    assert jnp.allclose(out, ref, rtol=1e-4, atol=1e-5), (out, ref)
    print("KERNEL_OK")
</pallas_src>

<mosaic_0001>
module attributes {stable_mosaic.version = 11 : i64} {
  func.func @_hausdorff_kernel(%arg0: i32, %arg1: memref<1xf32, #tpu.memory_space<smem>>, %arg2: memref<8x2x128xf32, #tpu.memory_space<vmem>>, %arg3: memref<8x64x2xf32, #tpu.memory_space<vmem>>, %arg4: memref<8x128xf32, #tpu.memory_space<vmem>>) attributes {dimension_semantics = [#tpu.dimension_semantics<parallel>], iteration_bounds = array<i64: 1>, scalar_prefetch = 1 : i64, scratch_operands = 0 : i64, tpu.core_type = #tpu.core_type<tc>, window_params = [{transform_indices = @transform_0, window_bounds = array<i64: 8, 2, 128>}, {transform_indices = @transform_1, window_bounds = array<i64: 8, 64, 2>}, {transform_indices = @transform_2, window_bounds = array<i64: 8, 128>}]} {
    %c0 = arith.constant 0 : index
    %0 = memref.load %arg1[%c0] : memref<1xf32, #tpu.memory_space<smem>>
    %c0_0 = arith.constant 0 : index
    %c0_1 = arith.constant 0 : index
    %c0_2 = arith.constant 0 : index
    %1 = vector.load %arg2[%c0_0, %c0_1, %c0_2] : memref<8x2x128xf32, #tpu.memory_space<vmem>>, vector<1x2x128xf32>
    %2 = vector.shape_cast %1 : vector<1x2x128xf32> to vector<2x128xf32>
    %c0_3 = arith.constant 0 : index
    %c0_4 = arith.constant 0 : index
    %c0_5 = arith.constant 0 : index
    %3 = vector.load %arg3[%c0_3, %c0_4, %c0_5] : memref<8x64x2xf32, #tpu.memory_space<vmem>>, vector<1x64x2xf32>
    %4 = vector.shape_cast %3 : vector<1x64x2xf32> to vector<64x2xf32>
    %5 = vector.extract_strided_slice %2 {offsets = [0, 0], sizes = [1, 128], strides = [1, 1]} : vector<2x128xf32> to vector<1x128xf32>
    %cst = arith.constant 9.99999997E-7 : f32
    %6 = vector.broadcast %cst : f32 to vector<1x128xf32>
    %7 = arith.addf %5, %6 : vector<1x128xf32>
    %8 = vector.extract_strided_slice %4 {offsets = [0, 0], sizes = [64, 1], strides = [1, 1]} : vector<64x2xf32> to vector<64x1xf32>
    %9 = vector.broadcast %7 : vector<1x128xf32> to vector<64x128xf32>
    %10 = vector.broadcast %8 : vector<64x1xf32> to vector<64x128xf32>
    %11 = arith.subf %9, %10 : vector<64x128xf32>
    %12 = arith.mulf %11, %11 : vector<64x128xf32>
    %13 = vector.extract_strided_slice %2 {offsets = [1, 0], sizes = [1, 128], strides = [1, 1]} : vector<2x128xf32> to vector<1x128xf32>
    %cst_6 = arith.constant 9.99999997E-7 : f32
    %14 = vector.broadcast %cst_6 : f32 to vector<1x128xf32>
    %15 = arith.addf %13, %14 : vector<1x128xf32>
    %16 = vector.extract_strided_slice %4 {offsets = [0, 1], sizes = [64, 1], strides = [1, 1]} : vector<64x2xf32> to vector<64x1xf32>
    %17 = vector.broadcast %15 : vector<1x128xf32> to vector<64x128xf32>
    %18 = vector.broadcast %16 : vector<64x1xf32> to vector<64x128xf32>
    %19 = arith.subf %17, %18 : vector<64x128xf32>
    %20 = arith.mulf %19, %19 : vector<64x128xf32>
    %21 = arith.addf %12, %20 : vector<64x128xf32>
    %22 = arith.addf %11, %19 : vector<64x128xf32>
    %cst_7 = arith.constant 4.000000e-06 : f32
    %23 = vector.broadcast %cst_7 : f32 to vector<64x128xf32>
    %24 = arith.mulf %23, %22 : vector<64x128xf32>
    %25 = arith.subf %21, %24 : vector<64x128xf32>
    %cst_8 = arith.constant 8.000000e-12 : f32
    %26 = vector.broadcast %cst_8 : f32 to vector<64x128xf32>
    %27 = arith.addf %25, %26 : vector<64x128xf32>
    %cst_9 = arith.constant dense<0x7F800000> : vector<64xf32>
    %28 = vector.multi_reduction <minimumf>, %21, %cst_9 [1] : vector<64x128xf32> to vector<64xf32>
    %29 = vector.shape_cast %28 : vector<64xf32> to vector<64x1xf32>
    %cst_10 = arith.constant dense<0xFF800000> : vector<1xf32>
    %30 = vector.multi_reduction <maximumf>, %29, %cst_10 [0] : vector<64x1xf32> to vector<1xf32>
    %31 = vector.shape_cast %30 : vector<1xf32> to vector<1x1xf32>
    %cst_11 = arith.constant dense<0x7F800000> : vector<128xf32>
    %32 = vector.multi_reduction <minimumf>, %27, %cst_11 [0] : vector<64x128xf32> to vector<128xf32>
    %33 = vector.shape_cast %32 : vector<128xf32> to vector<1x128xf32>
    %cst_12 = arith.constant dense<0xFF800000> : vector<1xf32>
    %34 = vector.multi_reduction <maximumf>, %33, %cst_12 [1] : vector<1x128xf32> to vector<1xf32>
    %35 = vector.shape_cast %34 : vector<1xf32> to vector<1x1xf32>
    %36 = arith.maximumf %31, %35 : vector<1x1xf32>
    %37 = math.sqrt %36 : vector<1x1xf32>
    %38 = vector.broadcast %0 : f32 to vector<1x1xf32>
    %39 = arith.mulf %37, %38 : vector<1x1xf32>
    %40 = vector.shape_cast %39 : vector<1x1xf32> to vector<1x1xf32>
    %41 = vector.broadcast %40 : vector<1x1xf32> to vector<1x128xf32>
    %c0_13 = arith.constant 0 : index
    %c0_14 = arith.constant 0 : index
    %42 = vector.load %arg4[%c0_13, %c0_14] : memref<8x128xf32, #tpu.memory_space<vmem>>, vector<1x128xf32>
    tpu.vector_store %arg4[%c0_13, %c0_14], %41 {strides = array<i32>} : memref<8x128xf32, #tpu.memory_space<vmem>>, vector<1x128xf32>,
    %c1 = arith.constant 1 : index
    %c0_15 = arith.constant 0 : index
    %c0_16 = arith.constant 0 : index
    %43 = vector.load %arg2[%c1, %c0_15, %c0_16] : memref<8x2x128xf32, #tpu.memory_space<vmem>>, vector<1x2x128xf32>
    %44 = vector.shape_cast %43 : vector<1x2x128xf32> to vector<2x128xf32>
    %c1_17 = arith.constant 1 : index
    %c0_18 = arith.constant 0 : index
    %c0_19 = arith.constant 0 : index
    %45 = vector.load %arg3[%c1_17, %c0_18, %c0_19] : memref<8x64x2xf32, #tpu.memory_space<vmem>>, vector<1x64x2xf32>
    %46 = vector.shape_cast %45 : vector<1x64x2xf32> to vector<64x2xf32>
    %47 = vector.extract_strided_slice %44 {offsets = [0, 0], sizes = [1, 128], strides = [1, 1]} : vector<2x128xf32> to vector<1x128xf32>
    %cst_20 = arith.constant 9.99999997E-7 : f32
    %48 = vector.broadcast %cst_20 : f32 to vector<1x128xf32>
    %49 = arith.addf %47, %48 : vector<1x128xf32>
    %50 = vector.extract_strided_slice %46 {offsets = [0, 0], sizes = [64, 1], strides = [1, 1]} : vector<64x2xf32> to vector<64x1xf32>
    %51 = vector.broadcast %49 : vector<1x128xf32> to vector<64x128xf32>
    %52 = vector.broadcast %50 : vector<64x1xf32> to vector<64x128xf32>
    %53 = arith.subf %51, %52 : vector<64x128xf32>
    %54 = arith.mulf %53, %53 : vector<64x128xf32>
    %55 = vector.extract_strided_slice %44 {offsets = [1, 0], sizes = [1, 128], strides = [1, 1]} : vector<2x128xf32> to vector<1x128xf32>
    %cst_21 = arith.constant 9.99999997E-7 : f32
    %56 = vector.broadcast %cst_21 : f32 to vector<1x128xf32>
    %57 = arith.addf %55, %56 : vector<1x128xf32>
    %58 = vector.extract_strided_slice %46 {offsets = [0, 1], sizes = [64, 1], strides = [1, 1]} : vector<64x2xf32> to vector<64x1xf32>
    %59 = vector.broadcast %57 : vector<1x128xf32> to vector<64x128xf32>
    %60 = vector.broadcast %58 : vector<64x1xf32> to vector<64x128xf32>
    %61 = arith.subf %59, %60 : vector<64x128xf32>
    %62 = arith.mulf %61, %61 : vector<64x128xf32>
    %63 = arith.addf %54, %62 : vector<64x128xf32>
    %64 = arith.addf %53, %61 : vector<64x128xf32>
    %cst_22 = arith.constant 4.000000e-06 : f32
    %65 = vector.broadcast %cst_22 : f32 to vector<64x128xf32>
    %66 = arith.mulf %65, %64 : vector<64x128xf32>
    %67 = arith.subf %63, %66 : vector<64x128xf32>
    %cst_23 = arith.constant 8.000000e-12 : f32
    %68 = vector.broadcast %cst_23 : f32 to vector<64x128xf32>
    %69 = arith.addf %67, %68 : vector<64x128xf32>
    %cst_24 = arith.constant dense<0x7F800000> : vector<64xf32>
    %70 = vector.multi_reduction <minimumf>, %63, %cst_24 [1] : vector<64x128xf32> to vector<64xf32>
    %71 = vector.shape_cast %70 : vector<64xf32> to vector<64x1xf32>
    %cst_25 = arith.constant dense<0xFF800000> : vector<1xf32>
    %72 = vector.multi_reduction <maximumf>, %71, %cst_25 [0] : vector<64x1xf32> to vector<1xf32>
    %73 = vector.shape_cast %72 : vector<1xf32> to vector<1x1xf32>
    %cst_26 = arith.constant dense<0x7F800000> : vector<128xf32>
    %74 = vector.multi_reduction <minimumf>, %69, %cst_26 [0] : vector<64x128xf32> to vector<128xf32>
    %75 = vector.shape_cast %74 : vector<128xf32> to vector<1x128xf32>
    %cst_27 = arith.constant dense<0xFF800000> : vector<1xf32>
    %76 = vector.multi_reduction <maximumf>, %75, %cst_27 [1] : vector<1x128xf32> to vector<1xf32>
    %77 = vector.shape_cast %76 : vector<1xf32> to vector<1x1xf32>
    %78 = arith.maximumf %73, %77 : vector<1x1xf32>
    %79 = math.sqrt %78 : vector<1x1xf32>
    %80 = vector.broadcast %0 : f32 to vector<1x1xf32>
    %81 = arith.mulf %79, %80 : vector<1x1xf32>
    %82 = vector.shape_cast %81 : vector<1x1xf32> to vector<1x1xf32>
    %83 = vector.broadcast %82 : vector<1x1xf32> to vector<1x128xf32>
    %c1_28 = arith.constant 1 : index
    %c0_29 = arith.constant 0 : index
    %84 = vector.load %arg4[%c1_28, %c0_29] : memref<8x128xf32, #tpu.memory_space<vmem>>, vector<1x128xf32>
    tpu.vector_store %arg4[%c1_28, %c0_29], %83 {strides = array<i32>} : memref<8x128xf32, #tpu.memory_space<vmem>>, vector<1x128xf32>,
    %c2 = arith.constant 2 : index
    %c0_30 = arith.constant 0 : index
    %c0_31 = arith.constant 0 : index
    %85 = vector.load %arg2[%c2, %c0_30, %c0_31] : memref<8x2x128xf32, #tpu.memory_space<vmem>>, vector<1x2x128xf32>
    %86 = vector.shape_cast %85 : vector<1x2x128xf32> to vector<2x128xf32>
    %c2_32 = arith.constant 2 : index
    %c0_33 = arith.constant 0 : index
    %c0_34 = arith.constant 0 : index
    %87 = vector.load %arg3[%c2_32, %c0_33, %c0_34] : memref<8x64x2xf32, #tpu.memory_space<vmem>>, vector<1x64x2xf32>
    %88 = vector.shape_cast %87 : vector<1x64x2xf32> to vector<64x2xf32>
    %89 = vector.extract_strided_slice %86 {offsets = [0, 0], sizes = [1, 128], strides = [1, 1]} : vector<2x128xf32> to vector<1x128xf32>
    %cst_35 = arith.constant 9.99999997E-7 : f32
    %90 = vector.broadcast %cst_35 : f32 to vector<1x128xf32>
    %91 = arith.addf %89, %90 : vector<1x128xf32>
    %92 = vector.extract_strided_slice %88 {offsets = [0, 0], sizes = [64, 1], strides = [1, 1]} : vector<64x2xf32> to vector<64x1xf32>
    %93 = vector.broadcast %91 : vector<1x128xf32> to vector<64x128xf32>
    %94 = vector.broadcast %92 : vector<64x1xf32> to vector<64x128xf32>
    %95 = arith.subf %93, %94 : vector<64x128xf32>
    %96 = arith.mulf %95, %95 : vector<64x128xf32>
    %97 = vector.extract_strided_slice %86 {offsets = [1, 0], sizes = [1, 128], strides = [1, 1]} : vector<2x128xf32> to vector<1x128xf32>
    %cst_36 = arith.constant 9.99999997E-7 : f32
    %98 = vector.broadcast %cst_36 : f32 to vector<1x128xf32>
    %99 = arith.addf %97, %98 : vector<1x128xf32>
    %100 = vector.extract_strided_slice %88 {offsets = [0, 1], sizes = [64, 1], strides = [1, 1]} : vector<64x2xf32> to vector<64x1xf32>
    %101 = vector.broadcast %99 : vector<1x128xf32> to vector<64x128xf32>
    %102 = vector.broadcast %100 : vector<64x1xf32> to vector<64x128xf32>
    %103 = arith.subf %101, %102 : vector<64x128xf32>
    %104 = arith.mulf %103, %103 : vector<64x128xf32>
    %105 = arith.addf %96, %104 : vector<64x128xf32>
    %106 = arith.addf %95, %103 : vector<64x128xf32>
    %cst_37 = arith.constant 4.000000e-06 : f32
    %107 = vector.broadcast %cst_37 : f32 to vector<64x128xf32>
    %108 = arith.mulf %107, %106 : vector<64x128xf32>
    %109 = arith.subf %105, %108 : vector<64x128xf32>
    %cst_38 = arith.constant 8.000000e-12 : f32
    %110 = vector.broadcast %cst_38 : f32 to vector<64x128xf32>
    %111 = arith.addf %109, %110 : vector<64x128xf32>
    %cst_39 = arith.constant dense<0x7F800000> : vector<64xf32>
    %112 = vector.multi_reduction <minimumf>, %105, %cst_39 [1] : vector<64x128xf32> to vector<64xf32>
    %113 = vector.shape_cast %112 : vector<64xf32> to vector<64x1xf32>
    %cst_40 = arith.constant dense<0xFF800000> : vector<1xf32>
    %114 = vector.multi_reduction <maximumf>, %113, %cst_40 [0] : vector<64x1xf32> to vector<1xf32>
    %115 = vector.shape_cast %114 : vector<1xf32> to vector<1x1xf32>
    %cst_41 = arith.constant dense<0x7F800000> : vector<128xf32>
    %116 = vector.multi_reduction <minimumf>, %111, %cst_41 [0] : vector<64x128xf32> to vector<128xf32>
    %117 = vector.shape_cast %116 : vector<128xf32> to vector<1x128xf32>
    %cst_42 = arith.constant dense<0xFF800000> : vector<1xf32>
    %118 = vector.multi_reduction <maximumf>, %117, %cst_42 [1] : vector<1x128xf32> to vector<1xf32>
    %119 = vector.shape_cast %118 : vector<1xf32> to vector<1x1xf32>
    %120 = arith.maximumf %115, %119 : vector<1x1xf32>
    %121 = math.sqrt %120 : vector<1x1xf32>
    %122 = vector.broadcast %0 : f32 to vector<1x1xf32>
    %123 = arith.mulf %121, %122 : vector<1x1xf32>
    %124 = vector.shape_cast %123 : vector<1x1xf32> to vector<1x1xf32>
    %125 = vector.broadcast %124 : vector<1x1xf32> to vector<1x128xf32>
    %c2_43 = arith.constant 2 : index
    %c0_44 = arith.constant 0 : index
    %126 = vector.load %arg4[%c2_43, %c0_44] : memref<8x128xf32, #tpu.memory_space<vmem>>, vector<1x128xf32>
    tpu.vector_store %arg4[%c2_43, %c0_44], %125 {strides = array<i32>} : memref<8x128xf32, #tpu.memory_space<vmem>>, vector<1x128xf32>,
    %c3 = arith.constant 3 : index
    %c0_45 = arith.constant 0 : index
    %c0_46 = arith.constant 0 : index
    %127 = vector.load %arg2[%c3, %c0_45, %c0_46] : memref<8x2x128xf32, #tpu.memory_space<vmem>>, vector<1x2x128xf32>
    %128 = vector.shape_cast %127 : vector<1x2x128xf32> to vector<2x128xf32>
    %c3_47 = arith.constant 3 : index
    %c0_48 = arith.constant 0 : index
    %c0_49 = arith.constant 0 : index
    %129 = vector.load %arg3[%c3_47, %c0_48, %c0_49] : memref<8x64x2xf32, #tpu.memory_space<vmem>>, vector<1x64x2xf32>
    %130 = vector.shape_cast %129 : vector<1x64x2xf32> to vector<64x2xf32>
    %131 = vector.extract_strided_slice %128 {offsets = [0, 0], sizes = [1, 128], strides = [1, 1]} : vector<2x128xf32> to vector<1x128xf32>
    %cst_50 = arith.constant 9.99999997E-7 : f32
    %132 = vector.broadcast %cst_50 : f32 to vector<1x128xf32>
    %133 = arith.addf %131, %132 : vector<1x128xf32>
    %134 = vector.extract_strided_slice %130 {offsets = [0, 0], sizes = [64, 1], strides = [1, 1]} : vector<64x2xf32> to vector<64x1xf32>
    %135 = vector.broadcast %133 : vector<1x128xf32> to vector<64x128xf32>
    %136 = vector.broadcast %134 : vector<64x1xf32> to vector<64x128xf32>
    %137 = arith.subf %135, %136 : vector<64x128xf32>
    %138 = arith.mulf %137, %137 : vector<64x128xf32>
    %139 = vector.extract_strided_slice %128 {offsets = [1, 0], sizes = [1, 128], strides = [1, 1]} : vector<2x128xf32> to vector<1x128xf32>
    %cst_51 = arith.constant 9.99999997E-7 : f32
    %140 = vector.broadcast %cst_51 : f32 to vector<1x128xf32>
    %141 = arith.addf %139, %140 : vector<1x128xf32>
    %142 = vector.extract_strided_slice %130 {offsets = [0, 1], sizes = [64, 1], strides = [1, 1]} : vector<64x2xf32> to vector<64x1xf32>
    %143 = vector.broadcast %141 : vector<1x128xf32> to vector<64x128xf32>
    %144 = vector.broadcast %142 : vector<64x1xf32> to vector<64x128xf32>
    %145 = arith.subf %143, %144 : vector<64x128xf32>
    %146 = arith.mulf %145, %145 : vector<64x128xf32>
    %147 = arith.addf %138, %146 : vector<64x128xf32>
    %148 = arith.addf %137, %145 : vector<64x128xf32>
    %cst_52 = arith.constant 4.000000e-06 : f32
    %149 = vector.broadcast %cst_52 : f32 to vector<64x128xf32>
    %150 = arith.mulf %149, %148 : vector<64x128xf32>
    %151 = arith.subf %147, %150 : vector<64x128xf32>
    %cst_53 = arith.constant 8.000000e-12 : f32
    %152 = vector.broadcast %cst_53 : f32 to vector<64x128xf32>
    %153 = arith.addf %151, %152 : vector<64x128xf32>
    %cst_54 = arith.constant dense<0x7F800000> : vector<64xf32>
    %154 = vector.multi_reduction <minimumf>, %147, %cst_54 [1] : vector<64x128xf32> to vector<64xf32>
    %155 = vector.shape_cast %154 : vector<64xf32> to vector<64x1xf32>
    %cst_55 = arith.constant dense<0xFF800000> : vector<1xf32>
    %156 = vector.multi_reduction <maximumf>, %155, %cst_55 [0] : vector<64x1xf32> to vector<1xf32>
    %157 = vector.shape_cast %156 : vector<1xf32> to vector<1x1xf32>
    %cst_56 = arith.constant dense<0x7F800000> : vector<128xf32>
    %158 = vector.multi_reduction <minimumf>, %153, %cst_56 [0] : vector<64x128xf32> to vector<128xf32>
    %159 = vector.shape_cast %158 : vector<128xf32> to vector<1x128xf32>
    %cst_57 = arith.constant dense<0xFF800000> : vector<1xf32>
    %160 = vector.multi_reduction <maximumf>, %159, %cst_57 [1] : vector<1x128xf32> to vector<1xf32>
    %161 = vector.shape_cast %160 : vector<1xf32> to vector<1x1xf32>
    %162 = arith.maximumf %157, %161 : vector<1x1xf32>
    %163 = math.sqrt %162 : vector<1x1xf32>
    %164 = vector.broadcast %0 : f32 to vector<1x1xf32>
    %165 = arith.mulf %163, %164 : vector<1x1xf32>
    %166 = vector.shape_cast %165 : vector<1x1xf32> to vector<1x1xf32>
    %167 = vector.broadcast %166 : vector<1x1xf32> to vector<1x128xf32>
    %c3_58 = arith.constant 3 : index
    %c0_59 = arith.constant 0 : index
    %168 = vector.load %arg4[%c3_58, %c0_59] : memref<8x128xf32, #tpu.memory_space<vmem>>, vector<1x128xf32>
    tpu.vector_store %arg4[%c3_58, %c0_59], %167 {strides = array<i32>} : memref<8x128xf32, #tpu.memory_space<vmem>>, vector<1x128xf32>,
    %c4 = arith.constant 4 : index
    %c0_60 = arith.constant 0 : index
    %c0_61 = arith.constant 0 : index
    %169 = vector.load %arg2[%c4, %c0_60, %c0_61] : memref<8x2x128xf32, #tpu.memory_space<vmem>>, vector<1x2x128xf32>
    %170 = vector.shape_cast %169 : vector<1x2x128xf32> to vector<2x128xf32>
    %c4_62 = arith.constant 4 : index
    %c0_63 = arith.constant 0 : index
    %c0_64 = arith.constant 0 : index
    %171 = vector.load %arg3[%c4_62, %c0_63, %c0_64] : memref<8x64x2xf32, #tpu.memory_space<vmem>>, vector<1x64x2xf32>
    %172 = vector.shape_cast %171 : vector<1x64x2xf32> to vector<64x2xf32>
    %173 = vector.extract_strided_slice %170 {offsets = [0, 0], sizes = [1, 128], strides = [1, 1]} : vector<2x128xf32> to vector<1x128xf32>
    %cst_65 = arith.constant 9.99999997E-7 : f32
    %174 = vector.broadcast %cst_65 : f32 to vector<1x128xf32>
    %175 = arith.addf %173, %174 : vector<1x128xf32>
    %176 = vector.extract_strided_slice %172 {offsets = [0, 0], sizes = [64, 1], strides = [1, 1]} : vector<64x2xf32> to vector<64x1xf32>
    %177 = vector.broadcast %175 : vector<1x128xf32> to vector<64x128xf32>
    %178 = vector.broadcast %176 : vector<64x1xf32> to vector<64x128xf32>
    %179 = arith.subf %177, %178 : vector<64x128xf32>
    %180 = arith.mulf %179, %179 : vector<64x128xf32>
    %181 = vector.extract_strided_slice %170 {offsets = [1, 0], sizes = [1, 128], strides = [1, 1]} : vector<2x128xf32> to vector<1x128xf32>
    %cst_66 = arith.constant 9.99999997E-7 : f32
    %182 = vector.broadcast %cst_66 : f32 to vector<1x128xf32>
    %183 = arith.addf %181, %182 : vector<1x128xf32>
    %184 = vector.extract_strided_slice %172 {offsets = [0, 1], sizes = [64, 1], strides = [1, 1]} : vector<64x2xf32> to vector<64x1xf32>
    %185 = vector.broadcast %183 : vector<1x128xf32> to vector<64x128xf32>
    %186 = vector.broadcast %184 : vector<64x1xf32> to vector<64x128xf32>
    %187 = arith.subf %185, %186 : vector<64x128xf32>
    %188 = arith.mulf %187, %187 : vector<64x128xf32>
    %189 = arith.addf %180, %188 : vector<64x128xf32>
    %190 = arith.addf %179, %187 : vector<64x128xf32>
    %cst_67 = arith.constant 4.000000e-06 : f32
    %191 = vector.broadcast %cst_67 : f32 to vector<64x128xf32>
    %192 = arith.mulf %191, %190 : vector<64x128xf32>
    %193 = arith.subf %189, %192 : vector<64x128xf32>
    %cst_68 = arith.constant 8.000000e-12 : f32
    %194 = vector.broadcast %cst_68 : f32 to vector<64x128xf32>
    %195 = arith.addf %193, %194 : vector<64x128xf32>
    %cst_69 = arith.constant dense<0x7F800000> : vector<64xf32>
    %196 = vector.multi_reduction <minimumf>, %189, %cst_69 [1] : vector<64x128xf32> to vector<64xf32>
    %197 = vector.shape_cast %196 : vector<64xf32> to vector<64x1xf32>
    %cst_70 = arith.constant dense<0xFF800000> : vector<1xf32>
    %198 = vector.multi_reduction <maximumf>, %197, %cst_70 [0] : vector<64x1xf32> to vector<1xf32>
    %199 = vector.shape_cast %198 : vector<1xf32> to vector<1x1xf32>
    %cst_71 = arith.constant dense<0x7F800000> : vector<128xf32>
    %200 = vector.multi_reduction <minimumf>, %195, %cst_71 [0] : vector<64x128xf32> to vector<128xf32>
    %201 = vector.shape_cast %200 : vector<128xf32> to vector<1x128xf32>
    %cst_72 = arith.constant dense<0xFF800000> : vector<1xf32>
    %202 = vector.multi_reduction <maximumf>, %201, %cst_72 [1] : vector<1x128xf32> to vector<1xf32>
    %203 = vector.shape_cast %202 : vector<1xf32> to vector<1x1xf32>
    %204 = arith.maximumf %199, %203 : vector<1x1xf32>
    %205 = math.sqrt %204 : vector<1x1xf32>
    %206 = vector.broadcast %0 : f32 to vector<1x1xf32>
    %207 = arith.mulf %205, %206 : vector<1x1xf32>
    %208 = vector.shape_cast %207 : vector<1x1xf32> to vector<1x1xf32>
    %209 = vector.broadcast %208 : vector<1x1xf32> to vector<1x128xf32>
    %c4_73 = arith.constant 4 : index
    %c0_74 = arith.constant 0 : index
    %210 = vector.load %arg4[%c4_73, %c0_74] : memref<8x128xf32, #tpu.memory_space<vmem>>, vector<1x128xf32>
    tpu.vector_store %arg4[%c4_73, %c0_74], %209 {strides = array<i32>} : memref<8x128xf32, #tpu.memory_space<vmem>>, vector<1x128xf32>,
    %c5 = arith.constant 5 : index
    %c0_75 = arith.constant 0 : index
    %c0_76 = arith.constant 0 : index
    %211 = vector.load %arg2[%c5, %c0_75, %c0_76] : memref<8x2x128xf32, #tpu.memory_space<vmem>>, vector<1x2x128xf32>
    %212 = vector.shape_cast %211 : vector<1x2x128xf32> to vector<2x128xf32>
    %c5_77 = arith.constant 5 : index
    %c0_78 = arith.constant 0 : index
    %c0_79 = arith.constant 0 : index
    %213 = vector.load %arg3[%c5_77, %c0_78, %c0_79] : memref<8x64x2xf32, #tpu.memory_space<vmem>>, vector<1x64x2xf32>
    %214 = vector.shape_cast %213 : vector<1x64x2xf32> to vector<64x2xf32>
    %215 = vector.extract_strided_slice %212 {offsets = [0, 0], sizes = [1, 128], strides = [1, 1]} : vector<2x128xf32> to vector<1x128xf32>
    %cst_80 = arith.constant 9.99999997E-7 : f32
    %216 = vector.broadcast %cst_80 : f32 to vector<1x128xf32>
    %217 = arith.addf %215, %216 : vector<1x128xf32>
    %218 = vector.extract_strided_slice %214 {offsets = [0, 0], sizes = [64, 1], strides = [1, 1]} : vector<64x2xf32> to vector<64x1xf32>
    %219 = vector.broadcast %217 : vector<1x128xf32> to vector<64x128xf32>
    %220 = vector.broadcast %218 : vector<64x1xf32> to vector<64x128xf32>
    %221 = arith.subf %219, %220 : vector<64x128xf32>
    %222 = arith.mulf %221, %221 : vector<64x128xf32>
    %223 = vector.extract_strided_slice %212 {offsets = [1, 0], sizes = [1, 128], strides = [1, 1]} : vector<2x128xf32> to vector<1x128xf32>
    %cst_81 = arith.constant 9.99999997E-7 : f32
    %224 = vector.broadcast %cst_81 : f32 to vector<1x128xf32>
    %225 = arith.addf %223, %224 : vector<1x128xf32>
    %226 = vector.extract_strided_slice %214 {offsets = [0, 1], sizes = [64, 1], strides = [1, 1]} : vector<64x2xf32> to vector<64x1xf32>
    %227 = vector.broadcast %225 : vector<1x128xf32> to vector<64x128xf32>
    %228 = vector.broadcast %226 : vector<64x1xf32> to vector<64x128xf32>
    %229 = arith.subf %227, %228 : vector<64x128xf32>
    %230 = arith.mulf %229, %229 : vector<64x128xf32>
    %231 = arith.addf %222, %230 : vector<64x128xf32>
    %232 = arith.addf %221, %229 : vector<64x128xf32>
    %cst_82 = arith.constant 4.000000e-06 : f32
    %233 = vector.broadcast %cst_82 : f32 to vector<64x128xf32>
    %234 = arith.mulf %233, %232 : vector<64x128xf32>
    %235 = arith.subf %231, %234 : vector<64x128xf32>
    %cst_83 = arith.constant 8.000000e-12 : f32
    %236 = vector.broadcast %cst_83 : f32 to vector<64x128xf32>
    %237 = arith.addf %235, %236 : vector<64x128xf32>
    %cst_84 = arith.constant dense<0x7F800000> : vector<64xf32>
    %238 = vector.multi_reduction <minimumf>, %231, %cst_84 [1] : vector<64x128xf32> to vector<64xf32>
    %239 = vector.shape_cast %238 : vector<64xf32> to vector<64x1xf32>
    %cst_85 = arith.constant dense<0xFF800000> : vector<1xf32>
    %240 = vector.multi_reduction <maximumf>, %239, %cst_85 [0] : vector<64x1xf32> to vector<1xf32>
    %241 = vector.shape_cast %240 : vector<1xf32> to vector<1x1xf32>
    %cst_86 = arith.constant dense<0x7F800000> : vector<128xf32>
    %242 = vector.multi_reduction <minimumf>, %237, %cst_86 [0] : vector<64x128xf32> to vector<128xf32>
    %243 = vector.shape_cast %242 : vector<128xf32> to vector<1x128xf32>
    %cst_87 = arith.constant dense<0xFF800000> : vector<1xf32>
    %244 = vector.multi_reduction <maximumf>, %243, %cst_87 [1] : vector<1x128xf32> to vector<1xf32>
    %245 = vector.shape_cast %244 : vector<1xf32> to vector<1x1xf32>
    %246 = arith.maximumf %241, %245 : vector<1x1xf32>
    %247 = math.sqrt %246 : vector<1x1xf32>
    %248 = vector.broadcast %0 : f32 to vector<1x1xf32>
    %249 = arith.mulf %247, %248 : vector<1x1xf32>
    %250 = vector.shape_cast %249 : vector<1x1xf32> to vector<1x1xf32>
    %251 = vector.broadcast %250 : vector<1x1xf32> to vector<1x128xf32>
    %c5_88 = arith.constant 5 : index
    %c0_89 = arith.constant 0 : index
    %252 = vector.load %arg4[%c5_88, %c0_89] : memref<8x128xf32, #tpu.memory_space<vmem>>, vector<1x128xf32>
    tpu.vector_store %arg4[%c5_88, %c0_89], %251 {strides = array<i32>} : memref<8x128xf32, #tpu.memory_space<vmem>>, vector<1x128xf32>,
    %c6 = arith.constant 6 : index
    %c0_90 = arith.constant 0 : index
    %c0_91 = arith.constant 0 : index
    %253 = vector.load %arg2[%c6, %c0_90, %c0_91] : memref<8x2x128xf32, #tpu.memory_space<vmem>>, vector<1x2x128xf32>
    %254 = vector.shape_cast %253 : vector<1x2x128xf32> to vector<2x128xf32>
    %c6_92 = arith.constant 6 : index
    %c0_93 = arith.constant 0 : index
    %c0_94 = arith.constant 0 : index
    %255 = vector.load %arg3[%c6_92, %c0_93, %c0_94] : memref<8x64x2xf32, #tpu.memory_space<vmem>>, vector<1x64x2xf32>
    %256 = vector.shape_cast %255 : vector<1x64x2xf32> to vector<64x2xf32>
    %257 = vector.extract_strided_slice %254 {offsets = [0, 0], sizes = [1, 128], strides = [1, 1]} : vector<2x128xf32> to vector<1x128xf32>
    %cst_95 = arith.constant 9.99999997E-7 : f32
    %258 = vector.broadcast %cst_95 : f32 to vector<1x128xf32>
    %259 = arith.addf %257, %258 : vector<1x128xf32>
    %260 = vector.extract_strided_slice %256 {offsets = [0, 0], sizes = [64, 1], strides = [1, 1]} : vector<64x2xf32> to vector<64x1xf32>
    %261 = vector.broadcast %259 : vector<1x128xf32> to vector<64x128xf32>
    %262 = vector.broadcast %260 : vector<64x1xf32> to vector<64x128xf32>
    %263 = arith.subf %261, %262 : vector<64x128xf32>
    %264 = arith.mulf %263, %263 : vector<64x128xf32>
    %265 = vector.extract_strided_slice %254 {offsets = [1, 0], sizes = [1, 128], strides = [1, 1]} : vector<2x128xf32> to vector<1x128xf32>
    %cst_96 = arith.constant 9.99999997E-7 : f32
    %266 = vector.broadcast %cst_96 : f32 to vector<1x128xf32>
    %267 = arith.addf %265, %266 : vector<1x128xf32>
    %268 = vector.extract_strided_slice %256 {offsets = [0, 1], sizes = [64, 1], strides = [1, 1]} : vector<64x2xf32> to vector<64x1xf32>
    %269 = vector.broadcast %267 : vector<1x128xf32> to vector<64x128xf32>
    %270 = vector.broadcast %268 : vector<64x1xf32> to vector<64x128xf32>
    %271 = arith.subf %269, %270 : vector<64x128xf32>
    %272 = arith.mulf %271, %271 : vector<64x128xf32>
    %273 = arith.addf %264, %272 : vector<64x128xf32>
    %274 = arith.addf %263, %271 : vector<64x128xf32>
    %cst_97 = arith.constant 4.000000e-06 : f32
    %275 = vector.broadcast %cst_97 : f32 to vector<64x128xf32>
    %276 = arith.mulf %275, %274 : vector<64x128xf32>
    %277 = arith.subf %273, %276 : vector<64x128xf32>
    %cst_98 = arith.constant 8.000000e-12 : f32
    %278 = vector.broadcast %cst_98 : f32 to vector<64x128xf32>
    %279 = arith.addf %277, %278 : vector<64x128xf32>
    %cst_99 = arith.constant dense<0x7F800000> : vector<64xf32>
    %280 = vector.multi_reduction <minimumf>, %273, %cst_99 [1] : vector<64x128xf32> to vector<64xf32>
    %281 = vector.shape_cast %280 : vector<64xf32> to vector<64x1xf32>
    %cst_100 = arith.constant dense<0xFF800000> : vector<1xf32>
    %282 = vector.multi_reduction <maximumf>, %281, %cst_100 [0] : vector<64x1xf32> to vector<1xf32>
    %283 = vector.shape_cast %282 : vector<1xf32> to vector<1x1xf32>
    %cst_101 = arith.constant dense<0x7F800000> : vector<128xf32>
    %284 = vector.multi_reduction <minimumf>, %279, %cst_101 [0] : vector<64x128xf32> to vector<128xf32>
    %285 = vector.shape_cast %284 : vector<128xf32> to vector<1x128xf32>
    %cst_102 = arith.constant dense<0xFF800000> : vector<1xf32>
    %286 = vector.multi_reduction <maximumf>, %285, %cst_102 [1] : vector<1x128xf32> to vector<1xf32>
    %287 = vector.shape_cast %286 : vector<1xf32> to vector<1x1xf32>
    %288 = arith.maximumf %283, %287 : vector<1x1xf32>
    %289 = math.sqrt %288 : vector<1x1xf32>
    %290 = vector.broadcast %0 : f32 to vector<1x1xf32>
    %291 = arith.mulf %289, %290 : vector<1x1xf32>
    %292 = vector.shape_cast %291 : vector<1x1xf32> to vector<1x1xf32>
    %293 = vector.broadcast %292 : vector<1x1xf32> to vector<1x128xf32>
    %c6_103 = arith.constant 6 : index
    %c0_104 = arith.constant 0 : index
    %294 = vector.load %arg4[%c6_103, %c0_104] : memref<8x128xf32, #tpu.memory_space<vmem>>, vector<1x128xf32>
    tpu.vector_store %arg4[%c6_103, %c0_104], %293 {strides = array<i32>} : memref<8x128xf32, #tpu.memory_space<vmem>>, vector<1x128xf32>,
    %c7 = arith.constant 7 : index
    %c0_105 = arith.constant 0 : index
    %c0_106 = arith.constant 0 : index
    %295 = vector.load %arg2[%c7, %c0_105, %c0_106] : memref<8x2x128xf32, #tpu.memory_space<vmem>>, vector<1x2x128xf32>
    %296 = vector.shape_cast %295 : vector<1x2x128xf32> to vector<2x128xf32>
    %c7_107 = arith.constant 7 : index
    %c0_108 = arith.constant 0 : index
    %c0_109 = arith.constant 0 : index
    %297 = vector.load %arg3[%c7_107, %c0_108, %c0_109] : memref<8x64x2xf32, #tpu.memory_space<vmem>>, vector<1x64x2xf32>
    %298 = vector.shape_cast %297 : vector<1x64x2xf32> to vector<64x2xf32>
    %299 = vector.extract_strided_slice %296 {offsets = [0, 0], sizes = [1, 128], strides = [1, 1]} : vector<2x128xf32> to vector<1x128xf32>
    %cst_110 = arith.constant 9.99999997E-7 : f32
    %300 = vector.broadcast %cst_110 : f32 to vector<1x128xf32>
    %301 = arith.addf %299, %300 : vector<1x128xf32>
    %302 = vector.extract_strided_slice %298 {offsets = [0, 0], sizes = [64, 1], strides = [1, 1]} : vector<64x2xf32> to vector<64x1xf32>
    %303 = vector.broadcast %301 : vector<1x128xf32> to vector<64x128xf32>
    %304 = vector.broadcast %302 : vector<64x1xf32> to vector<64x128xf32>
    %305 = arith.subf %303, %304 : vector<64x128xf32>
    %306 = arith.mulf %305, %305 : vector<64x128xf32>
    %307 = vector.extract_strided_slice %296 {offsets = [1, 0], sizes = [1, 128], strides = [1, 1]} : vector<2x128xf32> to vector<1x128xf32>
    %cst_111 = arith.constant 9.99999997E-7 : f32
    %308 = vector.broadcast %cst_111 : f32 to vector<1x128xf32>
    %309 = arith.addf %307, %308 : vector<1x128xf32>
    %310 = vector.extract_strided_slice %298 {offsets = [0, 1], sizes = [64, 1], strides = [1, 1]} : vector<64x2xf32> to vector<64x1xf32>
    %311 = vector.broadcast %309 : vector<1x128xf32> to vector<64x128xf32>
    %312 = vector.broadcast %310 : vector<64x1xf32> to vector<64x128xf32>
    %313 = arith.subf %311, %312 : vector<64x128xf32>
    %314 = arith.mulf %313, %313 : vector<64x128xf32>
    %315 = arith.addf %306, %314 : vector<64x128xf32>
    %316 = arith.addf %305, %313 : vector<64x128xf32>
    %cst_112 = arith.constant 4.000000e-06 : f32
    %317 = vector.broadcast %cst_112 : f32 to vector<64x128xf32>
    %318 = arith.mulf %317, %316 : vector<64x128xf32>
    %319 = arith.subf %315, %318 : vector<64x128xf32>
    %cst_113 = arith.constant 8.000000e-12 : f32
    %320 = vector.broadcast %cst_113 : f32 to vector<64x128xf32>
    %321 = arith.addf %319, %320 : vector<64x128xf32>
    %cst_114 = arith.constant dense<0x7F800000> : vector<64xf32>
    %322 = vector.multi_reduction <minimumf>, %315, %cst_114 [1] : vector<64x128xf32> to vector<64xf32>
    %323 = vector.shape_cast %322 : vector<64xf32> to vector<64x1xf32>
    %cst_115 = arith.constant dense<0xFF800000> : vector<1xf32>
    %324 = vector.multi_reduction <maximumf>, %323, %cst_115 [0] : vector<64x1xf32> to vector<1xf32>
    %325 = vector.shape_cast %324 : vector<1xf32> to vector<1x1xf32>
    %cst_116 = arith.constant dense<0x7F800000> : vector<128xf32>
    %326 = vector.multi_reduction <minimumf>, %321, %cst_116 [0] : vector<64x128xf32> to vector<128xf32>
    %327 = vector.shape_cast %326 : vector<128xf32> to vector<1x128xf32>
    %cst_117 = arith.constant dense<0xFF800000> : vector<1xf32>
    %328 = vector.multi_reduction <maximumf>, %327, %cst_117 [1] : vector<1x128xf32> to vector<1xf32>
    %329 = vector.shape_cast %328 : vector<1xf32> to vector<1x1xf32>
    %330 = arith.maximumf %325, %329 : vector<1x1xf32>
    %331 = math.sqrt %330 : vector<1x1xf32>
    %332 = vector.broadcast %0 : f32 to vector<1x1xf32>
    %333 = arith.mulf %331, %332 : vector<1x1xf32>
    %334 = vector.shape_cast %333 : vector<1x1xf32> to vector<1x1xf32>
    %335 = vector.broadcast %334 : vector<1x1xf32> to vector<1x128xf32>
    %c7_118 = arith.constant 7 : index
    %c0_119 = arith.constant 0 : index
    %336 = vector.load %arg4[%c7_118, %c0_119] : memref<8x128xf32, #tpu.memory_space<vmem>>, vector<1x128xf32>
    tpu.vector_store %arg4[%c7_118, %c0_119], %335 {strides = array<i32>} : memref<8x128xf32, #tpu.memory_space<vmem>>, vector<1x128xf32>,
    return
  }
  func.func @transform_0(%arg0: i32, %arg1: memref<1xf32, #tpu.memory_space<smem>>) -> (i32, i32, i32) {
    %c0_i32 = arith.constant 0 : i32
    %c0_i32_0 = arith.constant 0 : i32
    %c0_i32_1 = arith.constant 0 : i32
    return %arg0, %c0_i32, %c0_i32_0 : i32, i32, i32
  }
  func.func @transform_1(%arg0: i32, %arg1: memref<1xf32, #tpu.memory_space<smem>>) -> (i32, i32, i32) {
    %c0_i32 = arith.constant 0 : i32
    %c0_i32_0 = arith.constant 0 : i32
    %c0_i32_1 = arith.constant 0 : i32
    return %arg0, %c0_i32, %c0_i32_0 : i32, i32, i32
  }
  func.func @transform_2(%arg0: i32, %arg1: memref<1xf32, #tpu.memory_space<smem>>) -> (i32, i32) {
    %c0_i32 = arith.constant 0 : i32
    %c0_i32_0 = arith.constant 0 : i32
    return %arg0, %c0_i32 : i32, i32
  }
}

</mosaic_0001>

<bundles_post_ra>
// kernel: tpu_custom_call.1
= control target key start
LH: loop header
LB: loop body
LE: loop exit
PB: predicated region body
PF: predicated region fallthrough
CT: control target
= control target key end

     0   :  { %v1902_v2 = vmov 0   ;;  %s2561_s0 = inlined_call_operand.<no memory space> [shape: f32[1], index: 0, kind: input, shape index: {}]   ;;  %s2562_s1 = inlined_call_operand.vmem [shape: f32[8,2,128], index: 1, kind: input, shape index: {}]   ;;  %s2563_s2 = inlined_call_operand.vmem [shape: f32[8,64,2], index: 2, kind: input, shape index: {}]   ;;  %s2564_s3 = inlined_call_operand.hbm [shape: f32[8,128], index: 3, kind: output, shape index: {}]  }
   0x1   :  { %v18_v0 = vld [vmem:[%s2563_s2 + $0x10] sm:$0xff]  ;;  %v16_v1 = vld [vmem:[%s2563_s2] sm:$0xff]  ;;  %1839 = vset.pattern.permute.xlu1 %v1902_v2  ;;  %1838 = vset.pattern.permute.xlu0 %v1902_v2  ;;  %v19_v3 = vld [vmem:[%s2563_s2 + $0x18] sm:$0xff] }
   0x2   :  { %41 = vperm.xlu1 %1839, %v18_v0   ;;  %31 = vperm.xlu0 %1838, %v16_v1   ;;  %v17_v4 = vld [vmem:[%s2563_s2 + $0x8] sm:$0xff] }
   0x3   :  { %9 = vsyncpa [#allocation5], 0  ;;  %v21_v5 = vld [vmem:[%s2563_s2 + $0x28] sm:$0xff]  ;;  %v20_v6 = vld [vmem:[%s2563_s2 + $0x20] sm:$0xff]  ;;  %v1903_v9 = vmov 1   ;;  %v25_v20 = vlaneseq }
   0x4   :  { %v23_v7 = vld [vmem:[%s2563_s2 + $0x38] sm:$0xff]  ;;  %v22_v8 = vld [vmem:[%s2563_s2 + $0x30] sm:$0xff]  ;;  %v1773_v11 = vld [vmem:[%s2563_s2 + $0x40] sm:$0xff] }
   0x5   :  { %v1775_v10 = vld [vmem:[%s2563_s2 + $0x50] sm:$0xff]  ;;  %v1778_v12 = vld [vmem:[%s2563_s2 + $0x68] sm:$0xff]  ;;  %v1776_v13 = vld [vmem:[%s2563_s2 + $0x58] sm:$0xff]  ;;  %v26_v23 = vshrl.u32 %v25_v20, 7 }
   0x6   :  { %46 = vperm.xlu1 %1839, %v19_v3   ;;  %36 = vperm.xlu0 %1838, %v17_v4   ;;  %v1777_v14 = vld [vmem:[%s2563_s2 + $0x60] sm:$0xff]  ;;  %v1972_v15 = vld [vmem:[%s2563_s2 + $0x70] sm:$0xff]  ;;  %v1978_v16 = vld [vmem:[%s2563_s2 + $0x78] sm:$0xff] }
   0x7   :  { %v1985_v17 = vld [vmem:[%s2563_s2 + $0x48] sm:$0xff]  ;;  %v15_v24 = vld [vmem:[%s2562_s1] sm:$0x3]  ;;  %v1991_v27 = vsub.s32 1, %v26_v23  ;;  %v1993_v28 = vsub.s32 0, %v26_v23 }
   0x8   :  { %v24_v29 = vadd.f32 1e-06, %v15_v24 }
   0xa   :  { %56 = vperm.xlu1 %1839, %v21_v5   ;;  %51 = vperm.xlu0 %1838, %v20_v6   ;;  %v88_v32 = vrot.slane %v24_v29, %v1991_v27  ;;  %v28_v33 = vrot.slane %v24_v29, %v1993_v28 }
   0xe   :  { %66 = vperm.xlu1 %1839, %v23_v7   ;;  %61 = vperm.xlu0 %1838, %v22_v8  }
  0x12   :  { %1841 = vset.pattern.permute.xlu1 %v1903_v9  ;;  %1840 = vset.pattern.permute.xlu0 %v1903_v9 }
  0x13   :  { %94 = vperm.xlu1 %1841, %v17_v4   ;;  %90 = vperm.xlu0 %1840, %v16_v1  }
  0x17   :  { %98 = vperm.xlu1 %1841, %v18_v0   ;;  %102 = vperm.xlu0 %1840, %v19_v3  }
  0x1b   :  { %106 = vperm.xlu1 %1841, %v20_v6   ;;  %110 = vperm.xlu0 %1840, %v21_v5  }
  0x1f   :  { %114 = vperm.xlu1 %1841, %v22_v8   ;;  %118 = vperm.xlu0 %1840, %v23_v7  }
  0x23   :  { %1842 = vset.pattern.permute.xlu1 %v1902_v2  ;;  %317 = vperm.xlu0 %1840, %v1775_v10  }
  0x24   :  { %250 = vperm.xlu1 %1842, %v1773_v11  }
  0x27   :  { %329 = vperm.xlu0 %1840, %v1778_v12  }
  0x28   :  { %260 = vperm.xlu1 %1842, %v1775_v10  }
  0x2c   :  { %265 = vperm.xlu1 %1842, %v1776_v13  }
  0x30   :  { %270 = vperm.xlu1 %1842, %v1777_v14  }
  0x34   :  { %275 = vperm.xlu1 %1842, %v1778_v12  }
  0x38   :  { %280 = vperm.xlu1 %1842, %v1972_v15  }
  0x3c   :  { %285 = vperm.xlu1 %1842, %v1978_v16  }
  0x40   :  { %1843 = vset.pattern.permute.xlu1 %v1903_v9 }
  0x41   :  { %309 = vperm.xlu1 %1843, %v1773_v11  }
  0x45   :  { %313 = vperm.xlu1 %1843, %v1985_v17  }
  0x49   :  { %321 = vperm.xlu1 %1843, %v1776_v13  }
  0x4d   :  { %325 = vperm.xlu1 %1843, %v1777_v14  }
  0x81   :  { %v42_v18 = vpop.permute.xlu1 %41  ;;  %v32_v19 = vpop.permute.xlu0 %31 }
  0x82   :  { %v1997_v34 = vsub.f32 %v28_v33, %v32_v19  ;;  %v71_v40 = vsub.f32 %v28_v33, %v42_v18 }
  0x84   :  { %v77_v47 = vmul.f32 %v1997_v34, %v1997_v34  ;;  %v79_v52 = vmul.f32 %v71_v40, %v71_v40 }
  0x85   :  { %v47_v21 = vpop.permute.xlu1 %46  ;;  %v37_v22 = vpop.permute.xlu0 %36 }
  0x86   :  { %v1999_v35 = vsub.f32 %v28_v33, %v37_v22  ;;  %v72_v43 = vsub.f32 %v28_v33, %v47_v21 }
  0x88   :  { %v78_v46 = vmul.f32 %v1999_v35, %v1999_v35  ;;  %v80_v59 = vmul.f32 %v72_v43, %v72_v43 }
  0x89   :  { %v57_v25 = vpop.permute.xlu1 %56  ;;  %v52_v26 = vpop.permute.xlu0 %51 }
  0x8a   :  { %v74_v55 = vsub.f32 %v28_v33, %v57_v25  ;;  %v73_v56 = vsub.f32 %v28_v33, %v52_v26  ;;  %v1772_v25 = vld [vmem:[%s2562_s1 + $0x2] sm:$0x3] }
  0x8c   :  { %v81_v7 = vmul.f32 %v73_v56, %v73_v56  ;;  %v82_v8 = vmul.f32 %v74_v55, %v74_v55 }
  0x8d   :  { %v67_v30 = vpop.permute.xlu1 %66  ;;  %v62_v31 = vpop.permute.xlu0 %61 }
  0x8e   :  { %v75_v0 = vsub.f32 %v28_v33, %v62_v31  ;;  %v76_v4 = vsub.f32 %v28_v33, %v67_v30  ;;  %v243_v30 = vadd.f32 1e-06, %v1772_v25 }
  0x90   :  { %v83_v14 = vmul.f32 %v75_v0, %v75_v0  ;;  %v84_v20 = vmul.f32 %v76_v4, %v76_v4 }
  0x92   :  { %v95_v36 = vpop.permute.xlu1 %94  ;;  %v91_v37 = vpop.permute.xlu0 %90 }
  0x93   :  { %v2001_v38 = vsub.f32 %v88_v32, %v95_v36  ;;  %v2003_v39 = vsub.f32 %v88_v32, %v91_v37 }
  0x95   :  { %v130_v41 = vmul.f32 %v2001_v38, %v2001_v38  ;;  %v129_v42 = vmul.f32 %v2003_v39, %v2003_v39 }
  0x96   :  { %v99_v44 = vpop.permute.xlu1 %98  ;;  %v103_v45 = vpop.permute.xlu0 %102 }
  0x97   :  { %v123_v48 = vsub.f32 %v88_v32, %v99_v44  ;;  %v124_v49 = vsub.f32 %v88_v32, %v103_v45  ;;  %v2013_v50 = vadd.f32 %v130_v41, %v78_v46  ;;  %v2015_v51 = vadd.f32 %v129_v42, %v77_v47 }
  0x98   :  { %v2043_v45 = vrot.slane %v243_v30, %v1991_v27  ;;  %v146_v46 = vadd.f32 %v2001_v38, %v1999_v35  ;;  %v145_v47 = vadd.f32 %v2003_v39, %v1997_v34 }
  0x99   :  { %v131_v53 = vmul.f32 %v123_v48, %v123_v48  ;;  %v132_v54 = vmul.f32 %v124_v49, %v124_v49  ;;  %179 = vmin.xlane.f32.xlu0 %v2013_v50  ;;  %177 = vmin.xlane.f32.xlu1 %v2015_v51  ;;  %v147_v33 = vadd.f32 %v123_v48, %v71_v40 }
  0x9a   :  { %v107_v57 = vpop.permute.xlu1 %106  ;;  %v111_v58 = vpop.permute.xlu0 %110  ;;  %v148_v36 = vadd.f32 %v124_v49, %v72_v43 }
  0x9b   :  { %v125_v60 = vsub.f32 %v88_v32, %v107_v57  ;;  %v126_v61 = vsub.f32 %v88_v32, %v111_v58  ;;  %v2019_v62 = vadd.f32 %v131_v53, %v79_v52  ;;  %v2021_v63 = vadd.f32 %v132_v54, %v80_v59 }
  0x9c   :  { %v2050_v54 = vrot.slane %v243_v30, %v1993_v28  ;;  %v155_v43 = vmul.f32 4e-06, %v147_v33  ;;  %v156_v48 = vmul.f32 4e-06, %v148_v36  ;;  %v154_v58 = vmul.f32 4e-06, %v146_v46 }
  0x9d   :  { %v133_v1 = vmul.f32 %v125_v60, %v125_v60  ;;  %v134_v3 = vmul.f32 %v126_v61, %v126_v61  ;;  %181 = vmin.xlane.f32.xlu0 %v2019_v62  ;;  %183 = vmin.xlane.f32.xlu1 %v2021_v63  ;;  %v149_v42 = vadd.f32 %v125_v60, %v73_v56  ;;  %v153_v59 = vmul.f32 4e-06, %v145_v47 }
  0x9e   :  { %v115_v5 = vpop.permute.xlu1 %114  ;;  %v119_v6 = vpop.permute.xlu0 %118  ;;  %v150_v44 = vadd.f32 %v126_v61, %v74_v55  ;;  %v163_v61 = vsub.f32 %v2019_v62, %v155_v43 }
  0x9f   :  { %v127_v10 = vsub.f32 %v88_v32, %v115_v5  ;;  %v128_v11 = vsub.f32 %v88_v32, %v119_v6  ;;  %v2025_v12 = vadd.f32 %v133_v1, %v81_v7  ;;  %v2027_v13 = vadd.f32 %v134_v3, %v82_v8 }
  0xa0   :  { %v157_v55 = vmul.f32 4e-06, %v149_v42  ;;  %v158_v56 = vmul.f32 4e-06, %v150_v44  ;;  %v162_v7 = vsub.f32 %v2013_v50, %v154_v58  ;;  %v161_v8 = vsub.f32 %v2015_v51, %v153_v59 }
  0xa1   :  { %v135_v18 = vmul.f32 %v127_v10, %v127_v10  ;;  %v136_v19 = vmul.f32 %v128_v11, %v128_v11  ;;  %185 = vmin.xlane.f32.xlu0 %v2025_v12  ;;  %187 = vmin.xlane.f32.xlu1 %v2027_v13  ;;  %v151_v31 = vadd.f32 %v127_v10, %v75_v0 }
  0xa2   :  { %v2036_v26 = vpop.permute.xlu0 %317  ;;  %v152_v32 = vadd.f32 %v128_v11, %v76_v4  ;;  %v164_v0 = vsub.f32 %v2021_v63, %v156_v48  ;;  %v165_v3 = vsub.f32 %v2025_v12, %v157_v55  ;;  %v166_v4 = vsub.f32 %v2027_v13, %v158_v56 }
  0xa3   :  { %v251_v21 = vpop.permute.xlu1 %250  ;;  %v143_v22 = vadd.f32 %v135_v18, %v83_v14  ;;  %v144_v23 = vadd.f32 %v136_v19, %v84_v20  ;;  %v159_v52 = vmul.f32 4e-06, %v151_v31  ;;  %v170_v19 = vadd.f32 8e-12, %v162_v7 }
  0xa4   :  { %v160_v53 = vmul.f32 4e-06, %v152_v32  ;;  %v172_v12 = vadd.f32 8e-12, %v164_v0  ;;  %v173_v14 = vadd.f32 8e-12, %v165_v3  ;;  %v288_v18 = vsub.f32 %v2050_v54, %v251_v21 }
  0xa5   :  { %189 = vmin.xlane.f32.xlu0 %v143_v22  ;;  %191 = vmin.xlane.f32.xlu1 %v144_v23  ;;  %v167_v35 = vsub.f32 %v143_v22, %v159_v52  ;;  %v174_v13 = vadd.f32 8e-12, %v166_v4  ;;  %v169_v50 = vadd.f32 8e-12, %v161_v8 }
  0xa6   :  { %v330_v37 = vpop.permute.xlu0 %329  ;;  %v168_v38 = vsub.f32 %v144_v23, %v160_v53  ;;  %v296_v31 = vmul.f32 %v288_v18, %v288_v18 }
  0xa7   :  { %v2031_v24 = vpop.permute.xlu1 %260  ;;  %v345_v40 = vsub.f32 %v2043_v45, %v330_v37  ;;  %v175_v10 = vadd.f32 8e-12, %v167_v35  ;;  %v206_v22 = vmin.f32 %v169_v50, %v173_v14  ;;  %v207_v23 = vmin.f32 %v170_v19, %v174_v13 }
  0xa8   :  { %v176_v62 = vadd.f32 8e-12, %v168_v38  ;;  %v290_v14 = vsub.f32 %v2050_v54, %v2031_v24 }
  0xa9   :  { %v353_v39 = vmul.f32 %v345_v40, %v345_v40 }
  0xaa   :  { %v209_v51 = vmin.f32 %v172_v12, %v176_v62  ;;  %v342_v12 = vsub.f32 %v2043_v45, %v2036_v26 }
  0xab   :  { %v2038_v29 = vpop.permute.xlu1 %265 }
  0xac   :  { %v291_v21 = vsub.f32 %v2050_v54, %v2038_v29 }
  0xae   :  { %v299_v53 = vmul.f32 %v291_v21, %v291_v21 }
  0xaf   :  { %v2040_v41 = vpop.permute.xlu1 %270 }
  0xb0   :  { %v292_v7 = vsub.f32 %v2050_v54, %v2040_v41 }
  0xb2   :  { %v300_v19 = vmul.f32 %v292_v7, %v292_v7 }
  0xb3   :  { %v276_v49 = vpop.permute.xlu1 %275 }
  0xb4   :  { %v293_v57 = vsub.f32 %v2050_v54, %v276_v49 }
  0xb6   :  { %v369_v60 = vadd.f32 %v345_v40, %v293_v57  ;;  %v301_v34 = vmul.f32 %v293_v57, %v293_v57  ;;  %333 = vperm.xlu1 %1843, %v1972_v15   ;;  %v171_v15 = vadd.f32 8e-12, %v163_v61 }
  0xb7   :  { %v2057_v1 = vpop.permute.xlu1 %280 }
  0xb8   :  { %v2061_v5 = vmul.f32 4e-06, %v369_v60  ;;  %v2063_v6 = vadd.f32 %v353_v39, %v301_v34  ;;  %v208_v20 = vmin.f32 %v171_v15, %v175_v10  ;;  %v294_v13 = vsub.f32 %v2050_v54, %v2057_v1 }
  0xba   :  { %v385_v63 = vsub.f32 %v2063_v6, %v2061_v5  ;;  %1845 = vset.pattern.permute.xlu1 %v1902_v2  ;;  %v211_v32 = vmin.f32 %v208_v20, %v209_v51  ;;  %v302_v26 = vmul.f32 %v294_v13, %v294_v13 }
  0xbb   :  { %v286_v11 = vpop.permute.xlu1 %285  ;;  %337 = vperm.xlu0 %1840, %v1978_v16   ;;  %v210_v16 = vmin.f32 %v206_v22, %v207_v23 }
  0xbd   :  { %v212_v46 = vmin.f32 %v210_v16, %v211_v32 }
  0xbf   :  { %1844 = vset.pattern.permute.xlu0 %v1902_v2  ;;  %v213_v40 = vrot.slane %v212_v46, 4 }
  0xc0   :  { %v310_v25 = vpop.permute.xlu1 %309  ;;  %255 = vperm.xlu0 %1844, %v1985_v17  }
  0xc1   :  { %v340_v30 = vsub.f32 %v2043_v45, %v310_v25  ;;  %v214_v29 = vmin.f32 %v212_v46, %v213_v40  ;;  %v366_v25 = vadd.f32 %v342_v12, %v290_v14 }
  0xc3   :  { %v364_v33 = vadd.f32 %v340_v30, %v288_v18  ;;  %v348_v36 = vmul.f32 %v340_v30, %v340_v30  ;;  %v215_v57 = vrot.slane %v214_v29, 2  ;;  %v295_v18 = vsub.f32 %v2050_v54, %v286_v11 }
  0xc4   :  { %v314_v37 = vpop.permute.xlu1 %313  ;;  %v298_v30 = vmul.f32 %v290_v14, %v290_v14 }
  0xc5   :  { %v2077_v42 = vmul.f32 4e-06, %v364_v33  ;;  %v2079_v44 = vadd.f32 %v348_v36, %v296_v31  ;;  %v216_v58 = vmin.f32 %v214_v29, %v215_v57  ;;  %v350_v31 = vmul.f32 %v342_v12, %v342_v12 }
  0xc6   :  { %v341_v32 = vsub.f32 %v2043_v45, %v314_v37  ;;  %v303_v33 = vmul.f32 %v295_v18, %v295_v18 }
  0xc7   :  { %v380_v47 = vsub.f32 %v2079_v44, %v2077_v42  ;;  %v217_v59 = vrot.slane %v216_v58, 1 }
  0xc8   :  { %v322_v17 = vpop.permute.xlu1 %321 }
  0xc9   :  { %v343_v52 = vsub.f32 %v2043_v45, %v322_v17  ;;  %v218_v35 = vmin.f32 %v216_v58, %v217_v59 }
  0xcb   :  { %v367_v43 = vadd.f32 %v343_v52, %v291_v21  ;;  %v351_v48 = vmul.f32 %v343_v52, %v343_v52 }
  0xcc   :  { %v326_v38 = vpop.permute.xlu1 %325 }
  0xcd   :  { %v2084_v49 = vmul.f32 4e-06, %v367_v43  ;;  %v2086_v55 = vadd.f32 %v351_v48, %v299_v53  ;;  %v344_v8 = vsub.f32 %v2043_v45, %v326_v38  ;;  %v374_v53 = vmul.f32 4e-06, %v366_v25  ;;  %v1786_v25 = vld [vmem:[%s2563_s2 + $0xa0] sm:$0xff] }
  0xce   :  { %v358_v43 = vadd.f32 %v350_v31, %v298_v30  ;;  %v388_v38 = vadd.f32 8e-12, %v380_v47  ;;  %v1787_v31 = vld [vmem:[%s2563_s2 + $0xa8] sm:$0xff] }
  0xcf   :  { %v383_v56 = vsub.f32 %v2086_v55, %v2084_v49  ;;  %v368_v41 = vadd.f32 %v344_v8, %v292_v7  ;;  %v352_v51 = vmul.f32 %v344_v8, %v344_v8  ;;  %v349_v49 = vmul.f32 %v341_v32, %v341_v32 }
  0xd1   :  { %v376_v1 = vmul.f32 4e-06, %v368_v41  ;;  %v360_v11 = vadd.f32 %v352_v51, %v300_v19  ;;  %v391_v7 = vadd.f32 8e-12, %v383_v56 }
  0xda   :  { %396 = vmin.xlane.f32.xlu1 %v2079_v44 }
  0xde   :  { %402 = vmin.xlane.f32.xlu1 %v2086_v55 }
  0xdf   :  { %219 = vmax.xlane.f32.xlu0 %v218_v35  ;;  %v382_v35 = vsub.f32 %v358_v43, %v374_v53 }
  0xe2   :  { %406 = vmin.xlane.f32.xlu1 %v2063_v6 }
 0x126   :  { %v2093_v60 = vpop.xlane.xlu0 %179  ;;  %v2095_v34 = vpop.xlane.xlu1 %177 }
 0x12a   :  { %v2097_v39 = vpop.xlane.xlu0 %181  ;;  %v2099_v61 = vpop.xlane.xlu1 %183 }
 0x12e   :  { %v2101_v0 = vpop.xlane.xlu1 %187  ;;  %v2103_v3 = vpop.xlane.xlu0 %185 }
 0x12f   :  { %v194_v5 = vmax.f32 %v2093_v60, %v2101_v0 }
 0x132   :  { %v2105_v4 = vpop.xlane.xlu1 %191  ;;  %v2110_v10 = vpop.xlane.xlu0 %189 }
 0x133   :  { %v195_v42 = vmax.f32 %v2097_v39, %v2110_v10  ;;  %v196_v44 = vmax.f32 %v2099_v61, %v2105_v4  ;;  %v1785_v10 = vld [vmem:[%s2563_s2 + $0x98] sm:$0xff] }
 0x136   :  { %v334_v62 = vpop.permute.xlu1 %333 }
 0x137   :  { %v346_v15 = vsub.f32 %v2043_v45, %v334_v62 }
 0x139   :  { %v370_v50 = vadd.f32 %v346_v15, %v294_v13  ;;  %v354_v22 = vmul.f32 %v346_v15, %v346_v15  ;;  %v393_v15 = vadd.f32 8e-12, %v385_v63  ;;  %v390_v13 = vadd.f32 8e-12, %v382_v35 }
 0x13a   :  { %v338_v20 = vpop.permute.xlu0 %337  ;;  %v198_v63 = vmax.f32 %v195_v42, %v196_v44 }
 0x13b   :  { %v347_v23 = vsub.f32 %v2043_v45, %v338_v20  ;;  %v378_v16 = vmul.f32 4e-06, %v370_v50  ;;  %v362_v21 = vadd.f32 %v354_v22, %v302_v26  ;;  %v384_v45 = vsub.f32 %v360_v11, %v376_v1  ;;  %v1782_v20 = vld [vmem:[%s2563_s2 + $0x80] sm:$0xff] }
 0x13c   :  { %v193_v50 = vmax.f32 %v2095_v34, %v2103_v3  ;;  %v1784_v34 = vld [vmem:[%s2563_s2 + $0x90] sm:$0xff] }
 0x13d   :  { %v371_v24 = vadd.f32 %v347_v23, %v295_v18  ;;  %v355_v36 = vmul.f32 %v347_v23, %v347_v23  ;;  %v386_v37 = vsub.f32 %v362_v21, %v378_v16 }
 0x13e   :  { %v197_v39 = vmax.f32 %v193_v50, %v194_v5 }
 0x13f   :  { %v379_v46 = vmul.f32 4e-06, %v371_v24  ;;  %v256_v17 = vpop.permute.xlu0 %255  ;;  %v363_v52 = vadd.f32 %v355_v36, %v303_v33  ;;  %v394_v62 = vadd.f32 8e-12, %v386_v37  ;;  %v1789_v33 = vld [vmem:[%s2563_s2 + $0xb8] sm:$0xff] }
 0x140   :  { %v289_v40 = vsub.f32 %v2050_v54, %v256_v17  ;;  %v392_v54 = vadd.f32 8e-12, %v384_v45  ;;  %v199_v4 = vmax.f32 %v197_v39, %v198_v63 }
 0x141   :  { %v387_v48 = vsub.f32 %v363_v52, %v379_v46  ;;  %410 = vmin.xlane.f32.xlu1 %v363_v52  ;;  %v427_v41 = vmin.f32 %v390_v13, %v394_v62  ;;  %v2166_v52 = vstv %s2561_s0 }
 0x142   :  { %v365_v55 = vadd.f32 %v341_v32, %v289_v40  ;;  %v297_v29 = vmul.f32 %v289_v40, %v289_v40  ;;  %v425_v19 = vmin.f32 %v388_v38, %v392_v54  ;;  %v200_v0 = vrot.slane %v199_v4, 4  ;;  %v1788_v32 = vld [vmem:[%s2563_s2 + $0xb0] sm:$0xff] }
 0x143   :  { %v395_v58 = vadd.f32 8e-12, %v387_v48 }
 0x144   :  { %v373_v57 = vmul.f32 4e-06, %v365_v55  ;;  %v357_v59 = vadd.f32 %v349_v49, %v297_v29  ;;  %v201_v30 = vmax.f32 %v199_v4, %v200_v0 }
 0x145   :  { %v428_v12 = vmin.f32 %v391_v7, %v395_v58 }
 0x146   :  { %v381_v8 = vsub.f32 %v357_v59, %v373_v57  ;;  %398 = vmin.xlane.f32.xlu0 %v357_v59  ;;  %v202_v26 = vrot.slane %v201_v30, 2 }
 0x147   :  { %v430_v56 = vmin.f32 %v427_v41, %v428_v12 }
 0x148   :  { %v389_v14 = vadd.f32 8e-12, %v381_v8  ;;  %v203_v24 = vmax.f32 %v201_v30, %v202_v26 }
 0x14a   :  { %v426_v18 = vmin.f32 %v389_v14, %v393_v15  ;;  %400 = vmin.xlane.f32.xlu0 %v358_v43  ;;  %v204_v36 = vrot.slane %v203_v24, 1  ;;  %v1781_v14 = vld [vmem:[%s2562_s1 + $0x4] sm:$0x3] }
 0x14b   :  { %v461_v42 = vadd.f32 1e-06, %v1781_v14 }
 0x14c   :  { %v429_v47 = vmin.f32 %v425_v19, %v426_v18  ;;  %v205_v1 = vmax.f32 %v203_v24, %v204_v36 }
 0x14d   :  { %v465_v50 = vrot.slane %v461_v42, %v1993_v28  ;;  %v2175_v63 = vrot.slane %v461_v42, %v1991_v27 }
 0x14e   :  { %404 = vmin.xlane.f32.xlu0 %v360_v11  ;;  %v431_v6 = vmin.f32 %v429_v47, %v430_v56 }
 0x150   :  { %v432_v51 = vrot.slane %v431_v6, 4 }
 0x152   :  { %468 = vperm.xlu1 %1845, %v1782_v20   ;;  %408 = vmin.xlane.f32.xlu0 %v362_v21  ;;  %v433_v61 = vmin.f32 %v431_v6, %v432_v51  ;;  %v1783_v21 = vld [vmem:[%s2563_s2 + $0x88] sm:$0xff] }
 0x154   :  { %v434_v3 = vrot.slane %v433_v61, 2 }
 0x156   :  { %478 = vperm.xlu1 %1845, %v1784_v34   ;;  %v435_v60 = vmin.f32 %v433_v61, %v434_v3 }
 0x158   :  { %v436_v22 = vrot.slane %v435_v60, 1 }
 0x15a   :  { %483 = vperm.xlu1 %1845, %v1785_v10   ;;  %v437_v23 = vmin.f32 %v435_v60, %v436_v22 }
 0x15c   :  { %438 = vmax.xlane.f32.xlu0 %v437_v23 }
 0x15e   :  { %488 = vperm.xlu1 %1845, %v1786_v25  }
 0x162   :  { %493 = vperm.xlu1 %1845, %v1787_v31  }
 0x166   :  { %498 = vperm.xlu1 %1845, %v1788_v32  }
 0x167   :  { %v397_v49 = vpop.xlane.xlu1 %396 }
 0x16a   :  { %503 = vperm.xlu1 %1845, %v1789_v33  }
 0x16b   :  { %v403_v55 = vpop.xlane.xlu1 %402 }
 0x16c   :  { %v220_v16 = vpop.xlane.xlu0 %219 }
 0x16d   :  { %v221_v11 = vmax.f32 %v205_v1, %v220_v16 }
 0x16e   :  { %1846 = vset.pattern.permute.xlu1 %v1903_v9 }
 0x16f   :  { %1862 = vrsqrt.f32 %v221_v11  ;;  %527 = vperm.xlu1 %1846, %v1782_v20   ;;  %vm224_vm0 = vcmp.eq.f32.partialorder %v221_v11, inf  ;;  %v227_v53 = vand.u32 2147483648, %v221_v11  ;;  %vm226_vm1 = vcmp.eq.f32.partialorder %v221_v11, 0.0  ;;  %v407_v29 = vpop.xlane.xlu1 %406 }
 0x172   :  { %473 = vperm.xlu0 %1844, %v1783_v21  }
 0x173   :  { %535 = vperm.xlu1 %1846, %v1784_v34  }
 0x176   :  { %1847 = vset.pattern.permute.xlu0 %v1903_v9 }
 0x177   :  { %539 = vperm.xlu1 %1846, %v1785_v10   ;;  %531 = vperm.xlu0 %1847, %v1783_v21  }
 0x179   :  { %v1863_v46 = vpop.eup %1862 }
 0x17a   :  { %v223_v17 = vmul.f32 %v1863_v46, %v221_v11 }
 0x17b   :  { %547 = vperm.xlu1 %1846, %v1787_v31   ;;  %543 = vperm.xlu0 %1847, %v1786_v25  }
 0x17c   :  { %v225_v40 = vsel %vm224_vm0, %v221_v11, %v223_v17 }
 0x17d   :  { %v228_v43 = vsel %vm226_vm1, %v227_v53, %v225_v40 }
 0x17e   :  { %v230_v48 = vmul.f32 %v2166_v52, %v228_v43 }
 0x17f   :  { %555 = vperm.xlu1 %1846, %v1789_v33   ;;  %551 = vperm.xlu0 %1847, %v1788_v32  }
 0x180   :  { %231 = vst [vmem:[#allocation4] sm:$0x1] %v230_v48 }
 0x183   :  { %1848 = vset.pattern.permute.xlu1 %v1902_v2 }
 0x1ce   :  { %v411_v45 = vpop.xlane.xlu1 %410 }
 0x1cf   :  { %v415_v62 = vmax.f32 %v403_v55, %v411_v45 }
 0x1d2   :  { %v469_v37 = vpop.permute.xlu1 %468 }
 0x1d3   :  { %v399_v57 = vpop.xlane.xlu0 %398  ;;  %v506_v51 = vsub.f32 %v465_v50, %v469_v37 }
 0x1d4   :  { %v413_v15 = vmax.f32 %v399_v57, %v407_v29 }
 0x1d5   :  { %v514_v0 = vmul.f32 %v506_v51, %v506_v51 }
 0x1d6   :  { %v479_v58 = vpop.permute.xlu1 %478 }
 0x1d7   :  { %v401_v59 = vpop.xlane.xlu0 %400  ;;  %v508_v22 = vsub.f32 %v465_v50, %v479_v58 }
 0x1d9   :  { %v516_v46 = vmul.f32 %v508_v22, %v508_v22 }
 0x1da   :  { %v484_v35 = vpop.permute.xlu1 %483 }
 0x1db   :  { %v405_v38 = vpop.xlane.xlu0 %404  ;;  %v509_v26 = vsub.f32 %v465_v50, %v484_v35 }
 0x1dc   :  { %v412_v7 = vmax.f32 %v397_v49, %v405_v38 }
 0x1dd   :  { %v517_v48 = vmul.f32 %v509_v26, %v509_v26 }
 0x1de   :  { %v489_v8 = vpop.permute.xlu1 %488  ;;  %v416_v13 = vmax.f32 %v412_v7, %v413_v15 }
 0x1df   :  { %v409_v54 = vpop.xlane.xlu0 %408  ;;  %v510_v32 = vsub.f32 %v465_v50, %v489_v8 }
 0x1e0   :  { %v414_v12 = vmax.f32 %v401_v59, %v409_v54 }
 0x1e1   :  { %v518_v55 = vmul.f32 %v510_v32, %v510_v32 }
 0x1e2   :  { %v417_v18 = vmax.f32 %v414_v12, %v415_v62  ;;  %v494_v19 = vpop.permute.xlu1 %493 }
 0x1e3   :  { %v511_v24 = vsub.f32 %v465_v50, %v494_v19 }
 0x1e4   :  { %v418_v41 = vmax.f32 %v416_v13, %v417_v18 }
 0x1e5   :  { %v519_v49 = vmul.f32 %v511_v24, %v511_v24 }
 0x1e6   :  { %v419_v44 = vrot.slane %v418_v41, 4  ;;  %v499_v47 = vpop.permute.xlu1 %498 }
 0x1e7   :  { %v512_v36 = vsub.f32 %v465_v50, %v499_v47 }
 0x1e8   :  { %v420_v56 = vmax.f32 %v418_v41, %v419_v44 }
 0x1e9   :  { %v439_v39 = vpop.xlane.xlu0 %438  ;;  %v520_v8 = vmul.f32 %v512_v36, %v512_v36 }
 0x1ea   :  { %v421_v5 = vrot.slane %v420_v56, 2  ;;  %v504_v6 = vpop.permute.xlu1 %503 }
 0x1eb   :  { %v513_v17 = vsub.f32 %v465_v50, %v504_v6 }
 0x1ec   :  { %v422_v20 = vmax.f32 %v420_v56, %v421_v5 }
 0x1ed   :  { %v521_v15 = vmul.f32 %v513_v17, %v513_v17 }
 0x1ee   :  { %v423_v61 = vrot.slane %v422_v20, 1  ;;  %v528_v4 = vpop.permute.xlu1 %527 }
 0x1ef   :  { %v558_v34 = vsub.f32 %v2175_v63, %v528_v4 }
 0x1f0   :  { %v424_v3 = vmax.f32 %v422_v20, %v423_v61 }
 0x1f1   :  { %v474_v60 = vpop.permute.xlu0 %473  ;;  %v566_v10 = vmul.f32 %v558_v34, %v558_v34  ;;  %v582_v1 = vadd.f32 %v558_v34, %v506_v51 }
 0x1f2   :  { %v2178_v23 = vmax.f32 %v424_v3, %v439_v39  ;;  %v536_v25 = vpop.permute.xlu1 %535  ;;  %v507_v16 = vsub.f32 %v465_v50, %v474_v60 }
 0x1f3   :  { %v560_v30 = vsub.f32 %v2175_v63, %v536_v25  ;;  %v2181_v31 = vadd.f32 %v566_v10, %v514_v0  ;;  %v590_v58 = vmul.f32 4e-06, %v582_v1 }
 0x1f4   :  { %1864 = vrsqrt.f32 %v2178_v23  ;;  %v515_v7 = vmul.f32 %v507_v16, %v507_v16  ;;  %vm443_vm2 = vcmp.eq.f32.partialorder %v2178_v23, inf  ;;  %vm445_vm3 = vcmp.eq.f32.partialorder %v2178_v23, 0.0 }
 0x1f5   :  { %614 = vmin.xlane.f32.xlu0 %v2181_v31  ;;  %v568_v33 = vmul.f32 %v560_v30, %v560_v30  ;;  %v584_v59 = vadd.f32 %v560_v30, %v508_v22  ;;  %v446_v56 = vand.u32 2147483648, %v2178_v23  ;;  %v598_v5 = vsub.f32 %v2181_v31, %v590_v58 }
 0x1f6   :  { %v540_v11 = vpop.permute.xlu1 %539  ;;  %v532_v21 = vpop.permute.xlu0 %531 }
 0x1f7   :  { %v561_v53 = vsub.f32 %v2175_v63, %v540_v11  ;;  %v559_v40 = vsub.f32 %v2175_v63, %v532_v21  ;;  %v2187_v43 = vadd.f32 %v568_v33, %v516_v46  ;;  %v592_v50 = vmul.f32 4e-06, %v584_v59 }
 0x1f9   :  { %v585_v29 = vadd.f32 %v561_v53, %v509_v26  ;;  %v583_v45 = vadd.f32 %v559_v40, %v507_v16  ;;  %v569_v37 = vmul.f32 %v561_v53, %v561_v53  ;;  %v567_v57 = vmul.f32 %v559_v40, %v559_v40  ;;  %618 = vmin.xlane.f32.xlu0 %v2187_v43 }
 0x1fa   :  { %v548_v35 = vpop.permute.xlu1 %547  ;;  %v544_v38 = vpop.permute.xlu0 %543  ;;  %v600_v11 = vsub.f32 %v2187_v43, %v592_v50 }
 0x1fb   :  { %v563_v54 = vsub.f32 %v2175_v63, %v548_v35  ;;  %v562_v62 = vsub.f32 %v2175_v63, %v544_v38  ;;  %v593_v12 = vmul.f32 4e-06, %v585_v29  ;;  %v591_v14 = vmul.f32 4e-06, %v583_v45 }
 0x1fc   :  { %v577_v13 = vadd.f32 %v569_v37, %v517_v48  ;;  %v575_v18 = vadd.f32 %v567_v57, %v515_v7  ;;  %v608_v29 = vadd.f32 8e-12, %v600_v11 }
 0x1fd   :  { %v587_v19 = vadd.f32 %v563_v54, %v511_v24  ;;  %v586_v41 = vadd.f32 %v562_v62, %v510_v32  ;;  %v571_v42 = vmul.f32 %v563_v54, %v563_v54  ;;  %v570_v44 = vmul.f32 %v562_v62, %v562_v62 }
 0x1fe   :  { %v1865_v47 = vpop.eup %1864  ;;  %620 = vmin.xlane.f32.xlu0 %v577_v13  ;;  %616 = vmin.xlane.f32.xlu1 %v575_v18  ;;  %v556_v6 = vpop.permute.xlu1 %555  ;;  %v601_v34 = vsub.f32 %v577_v13, %v593_v12  ;;  %v599_v3 = vsub.f32 %v575_v18, %v591_v14  ;;  %v1792_v12 = vld [vmem:[%s2563_s2 + $0xc8] sm:$0xff]  ;;  %v1795_v13 = vld [vmem:[%s2563_s2 + $0xe0] sm:$0xff]  ;;  %v1797_v18 = vld [vmem:[%s2563_s2 + $0xf0] sm:$0xff] }
 0x1ff   :  { %v552_v20 = vpop.permute.xlu0 %551  ;;  %v442_v51 = vmul.f32 %v1865_v47, %v2178_v23  ;;  %v595_v39 = vmul.f32 4e-06, %v587_v19  ;;  %v594_v61 = vmul.f32 4e-06, %v586_v41  ;;  %v565_v4 = vsub.f32 %v2175_v63, %v556_v6  ;;  %v1791_v19 = vld [vmem:[%s2563_s2 + $0xc0] sm:$0xff]  ;;  %v1793_v41 = vld [vmem:[%s2563_s2 + $0xd0] sm:$0xff] }
 0x200   :  { %v564_v60 = vsub.f32 %v2175_v63, %v552_v20  ;;  %v579_v0 = vadd.f32 %v571_v42, %v519_v49  ;;  %v578_v25 = vadd.f32 %v570_v44, %v518_v55  ;;  %v607_v48 = vadd.f32 8e-12, %v599_v3  ;;  %v1794_v42 = vld [vmem:[%s2563_s2 + $0xd8] sm:$0xff]  ;;  %v1796_v44 = vld [vmem:[%s2563_s2 + $0xe8] sm:$0xff] }
 0x201   :  { %v444_v10 = vsel %vm443_vm2, %v2178_v23, %v442_v51  ;;  %v589_v22 = vadd.f32 %v565_v4, %v513_v17  ;;  %v573_v30 = vmul.f32 %v565_v4, %v565_v4  ;;  %v606_v23 = vadd.f32 8e-12, %v598_v5  ;;  %v1798_v47 = vld [vmem:[%s2563_s2 + $0xf8] sm:$0xff] }
 0x202   :  { %v447_v31 = vsel %vm445_vm3, %v446_v56, %v444_v10  ;;  %v588_v26 = vadd.f32 %v564_v60, %v512_v36  ;;  %v603_v32 = vsub.f32 %v579_v0, %v595_v39  ;;  %624 = vmin.xlane.f32.xlu0 %v579_v0  ;;  %v572_v24 = vmul.f32 %v564_v60, %v564_v60 }
 0x203   :  { %v448_v33 = vmul.f32 %v447_v31, %v2166_v52  ;;  %v597_v1 = vmul.f32 4e-06, %v589_v22  ;;  %622 = vmin.xlane.f32.xlu1 %v578_v25  ;;  %v602_v63 = vsub.f32 %v578_v25, %v594_v61  ;;  %v581_v16 = vadd.f32 %v573_v30, %v521_v15 }
 0x204   :  { %v596_v21 = vmul.f32 4e-06, %v588_v26  ;;  %v611_v46 = vadd.f32 8e-12, %v603_v32  ;;  %v580_v17 = vadd.f32 %v572_v24, %v520_v8  ;;  %v609_v49 = vadd.f32 8e-12, %v601_v34 }
 0x205   :  { %449 = vst [vmem:[#allocation4 + $0x1] sm:$0x1] %v448_v33  ;;  %v610_v53 = vadd.f32 8e-12, %v602_v63  ;;  %v605_v40 = vsub.f32 %v581_v16, %v597_v1  ;;  %v1790_v26 = vld [vmem:[%s2562_s1 + $0x6] sm:$0x3] }
 0x206   :  { %628 = vmin.xlane.f32.xlu0 %v581_v16  ;;  %v604_v36 = vsub.f32 %v580_v17, %v596_v21  ;;  %v644_v45 = vmin.f32 %v607_v48, %v611_v46  ;;  %v679_v24 = vadd.f32 1e-06, %v1790_v26 }
 0x207   :  { %v613_v55 = vadd.f32 8e-12, %v605_v40  ;;  %626 = vmin.xlane.f32.xlu1 %v580_v17  ;;  %v643_v37 = vmin.f32 %v606_v23, %v610_v53 }
 0x208   :  { %v612_v57 = vadd.f32 8e-12, %v604_v36  ;;  %v2237_v1 = vrot.slane %v679_v24, %v1991_v27  ;;  %v2240_v46 = vrot.slane %v679_v24, %v1993_v28 }
 0x209   :  { %v646_v58 = vmin.f32 %v609_v49, %v613_v55  ;;  %v647_v43 = vmin.f32 %v643_v37, %v644_v45 }
 0x20a   :  { %v645_v59 = vmin.f32 %v608_v29, %v612_v57 }
 0x20c   :  { %v648_v35 = vmin.f32 %v645_v59, %v646_v58 }
 0x20e   :  { %v649_v38 = vmin.f32 %v647_v43, %v648_v35 }
 0x210   :  { %v650_v7 = vrot.slane %v649_v38, 4 }
 0x212   :  { %v651_v8 = vmin.f32 %v649_v38, %v650_v7 }
 0x214   :  { %v652_v54 = vrot.slane %v651_v8, 2 }
 0x216   :  { %v653_v62 = vmin.f32 %v651_v8, %v652_v54 }
 0x218   :  { %v654_v15 = vrot.slane %v653_v62, 1 }
 0x21a   :  { %v655_v14 = vmin.f32 %v653_v62, %v654_v15 }
 0x21c   :  { %749 = vperm.xlu0 %1847, %v1792_v12   ;;  %656 = vmax.xlane.f32.xlu1 %v655_v14 }
 0x220   :  { %761 = vperm.xlu0 %1847, %v1795_v13  }
 0x224   :  { %769 = vperm.xlu0 %1847, %v1797_v18  }
 0x228   :  { %1850 = vset.pattern.permute.xlu0 %v1902_v2 }
 0x229   :  { %686 = vperm.xlu0 %1850, %v1791_v19  }
 0x22d   :  { %691 = vperm.xlu1 %1848, %v1792_v12  }
 0x231   :  { %696 = vperm.xlu1 %1848, %v1793_v41  }
 0x235   :  { %701 = vperm.xlu1 %1848, %v1794_v42  }
 0x239   :  { %706 = vperm.xlu1 %1848, %v1795_v13  }
 0x23d   :  { %711 = vperm.xlu1 %1848, %v1796_v44  }
 0x241   :  { %716 = vperm.xlu1 %1848, %v1797_v18  }
 0x245   :  { %721 = vperm.xlu1 %1848, %v1798_v47  }
 0x249   :  { %1849 = vset.pattern.permute.xlu1 %v1903_v9 }
 0x24a   :  { %745 = vperm.xlu1 %1849, %v1791_v19  }
 0x24e   :  { %753 = vperm.xlu1 %1849, %v1793_v41  }
 0x252   :  { %757 = vperm.xlu1 %1849, %v1794_v42  }
 0x256   :  { %765 = vperm.xlu1 %1849, %v1796_v44  }
 0x25a   :  { %773 = vperm.xlu1 %1849, %v1798_v47  }
 0x25e   :  { %1851 = vset.pattern.permute.xlu1 %v1902_v2 }
 0x282   :  { %v615_v56 = vpop.xlane.xlu0 %614 }
 0x286   :  { %v619_v50 = vpop.xlane.xlu0 %618 }
 0x28b   :  { %v617_v5 = vpop.xlane.xlu1 %616  ;;  %v621_v6 = vpop.xlane.xlu0 %620 }
 0x28f   :  { %v625_v20 = vpop.xlane.xlu0 %624 }
 0x290   :  { %v623_v51 = vpop.xlane.xlu1 %622  ;;  %v631_v61 = vmax.f32 %v617_v5, %v625_v20 }
 0x291   :  { %v630_v39 = vmax.f32 %v615_v56, %v623_v51 }
 0x293   :  { %v629_v4 = vpop.xlane.xlu0 %628  ;;  %v634_v0 = vmax.f32 %v630_v39, %v631_v61 }
 0x294   :  { %v627_v34 = vpop.xlane.xlu1 %626  ;;  %v633_v3 = vmax.f32 %v621_v6, %v629_v4 }
 0x295   :  { %v632_v60 = vmax.f32 %v619_v50, %v627_v34 }
 0x297   :  { %v635_v10 = vmax.f32 %v632_v60, %v633_v3 }
 0x299   :  { %v636_v22 = vmax.f32 %v634_v0, %v635_v10 }
 0x29b   :  { %v637_v25 = vrot.slane %v636_v22, 4  ;;  %v750_v16 = vpop.permute.xlu0 %749 }
 0x29c   :  { %v777_v17 = vsub.f32 %v2237_v1, %v750_v16 }
 0x29d   :  { %v638_v30 = vmax.f32 %v636_v22, %v637_v25 }
 0x29e   :  { %v785_v23 = vmul.f32 %v777_v17, %v777_v17 }
 0x29f   :  { %v639_v31 = vrot.slane %v638_v30, 2  ;;  %v762_v55 = vpop.permute.xlu0 %761 }
 0x2a0   :  { %v780_v57 = vsub.f32 %v2237_v1, %v762_v55 }
 0x2a1   :  { %v640_v32 = vmax.f32 %v638_v30, %v639_v31 }
 0x2a2   :  { %v788_v8 = vmul.f32 %v780_v57, %v780_v57 }
 0x2a3   :  { %v641_v33 = vrot.slane %v640_v32, 1  ;;  %v770_v62 = vpop.permute.xlu0 %769 }
 0x2a4   :  { %v782_v14 = vsub.f32 %v2237_v1, %v770_v62 }
 0x2a5   :  { %v642_v63 = vmax.f32 %v640_v32, %v641_v33 }
 0x2a6   :  { %v790_v41 = vmul.f32 %v782_v14, %v782_v14 }
 0x2a8   :  { %v687_v19 = vpop.permute.xlu0 %686 }
 0x2a9   :  { %v657_v11 = vpop.xlane.xlu1 %656  ;;  %v724_v56 = vsub.f32 %v2240_v46, %v687_v19 }
 0x2aa   :  { %v658_v21 = vmax.f32 %v642_v63, %v657_v11 }
 0x2ab   :  { %v732_v6 = vmul.f32 %v724_v56, %v724_v56 }
 0x2ac   :  { %1866 = vrsqrt.f32 %v658_v21  ;;  %vm661_vm4 = vcmp.eq.f32.partialorder %v658_v21, inf  ;;  %v664_v58 = vand.u32 2147483648, %v658_v21  ;;  %vm663_vm5 = vcmp.eq.f32.partialorder %v658_v21, 0.0 }
 0x2ad   :  { %v692_v53 = vpop.permute.xlu1 %691 }
 0x2ae   :  { %v725_v40 = vsub.f32 %v2240_v46, %v692_v53 }
 0x2b0   :  { %v733_v48 = vmul.f32 %v725_v40, %v725_v40  ;;  %v801_v25 = vadd.f32 %v777_v17, %v725_v40 }
 0x2b1   :  { %v697_v36 = vpop.permute.xlu1 %696 }
 0x2b2   :  { %v2244_v49 = vadd.f32 %v785_v23, %v733_v48  ;;  %v726_v20 = vsub.f32 %v2240_v46, %v697_v36  ;;  %v809_v23 = vmul.f32 4e-06, %v801_v25  ;;  %v1800_v25 = vld [vmem:[%s2563_s2 + $0x100] sm:$0xff] }
 0x2b4   :  { %834 = vmin.xlane.f32.xlu1 %v2244_v49  ;;  %v734_v3 = vmul.f32 %v726_v20, %v726_v20 }
 0x2b5   :  { %v702_v29 = vpop.permute.xlu1 %701 }
 0x2b6   :  { %v1867_v45 = vpop.eup %1866  ;;  %v727_v34 = vsub.f32 %v2240_v46, %v702_v29 }
 0x2b7   :  { %v660_v37 = vmul.f32 %v1867_v45, %v658_v21 }
 0x2b8   :  { %v735_v32 = vmul.f32 %v727_v34, %v727_v34 }
 0x2b9   :  { %v662_v59 = vsel %vm661_vm4, %v658_v21, %v660_v37  ;;  %v707_v43 = vpop.permute.xlu1 %706 }
 0x2ba   :  { %v665_v35 = vsel %vm663_vm5, %v664_v58, %v662_v59  ;;  %v728_v38 = vsub.f32 %v2240_v46, %v707_v43 }
 0x2bb   :  { %v666_v7 = vmul.f32 %v665_v35, %v2166_v52 }
 0x2bc   :  { %v736_v54 = vmul.f32 %v728_v38, %v728_v38  ;;  %v804_v33 = vadd.f32 %v780_v57, %v728_v38  ;;  %v817_v38 = vsub.f32 %v2244_v49, %v809_v23 }
 0x2bd   :  { %667 = vst [vmem:[#allocation4 + $0x2] sm:$0x1] %v666_v7  ;;  %v712_v15 = vpop.permute.xlu1 %711 }
 0x2be   :  { %v2250_v12 = vadd.f32 %v788_v8, %v736_v54  ;;  %v729_v31 = vsub.f32 %v2240_v46, %v712_v15  ;;  %v812_v45 = vmul.f32 4e-06, %v804_v33  ;;  %v1802_v33 = vld [vmem:[%s2563_s2 + $0x110] sm:$0xff] }
 0x2c0   :  { %840 = vmin.xlane.f32.xlu1 %v2250_v12  ;;  %v737_v40 = vmul.f32 %v729_v31, %v729_v31 }
 0x2c1   :  { %v717_v13 = vpop.permute.xlu1 %716 }
 0x2c2   :  { %v730_v18 = vsub.f32 %v2240_v46, %v717_v13 }
 0x2c4   :  { %v738_v42 = vmul.f32 %v730_v18, %v730_v18  ;;  %v806_v63 = vadd.f32 %v782_v14, %v730_v18  ;;  %v820_v14 = vsub.f32 %v2250_v12, %v812_v45 }
 0x2c5   :  { %v722_v44 = vpop.permute.xlu1 %721 }
 0x2c6   :  { %v2255_v47 = vadd.f32 %v790_v41, %v738_v42  ;;  %v731_v48 = vsub.f32 %v2240_v46, %v722_v44  ;;  %v814_v37 = vmul.f32 4e-06, %v806_v63  ;;  %v825_v44 = vadd.f32 8e-12, %v817_v38  ;;  %v1804_v63 = vld [vmem:[%s2563_s2 + $0x120] sm:$0xff] }
 0x2c7   :  { %v828_v49 = vadd.f32 8e-12, %v820_v14 }
 0x2c8   :  { %844 = vmin.xlane.f32.xlu1 %v2255_v47  ;;  %v739_v8 = vmul.f32 %v731_v48, %v731_v48  ;;  %v822_v13 = vsub.f32 %v2255_v47, %v814_v37 }
 0x2c9   :  { %v746_v50 = vpop.permute.xlu1 %745 }
 0x2ca   :  { %v776_v5 = vsub.f32 %v2237_v1, %v746_v50 }
 0x2cc   :  { %v784_v51 = vmul.f32 %v776_v5, %v776_v5  ;;  %v800_v30 = vadd.f32 %v776_v5, %v724_v56  ;;  %v830_v5 = vadd.f32 8e-12, %v822_v13 }
 0x2cd   :  { %v754_v39 = vpop.permute.xlu1 %753 }
 0x2ce   :  { %v778_v61 = vsub.f32 %v2237_v1, %v754_v39  ;;  %v792_v4 = vadd.f32 %v784_v51, %v732_v6  ;;  %v808_v36 = vmul.f32 4e-06, %v800_v30 }
 0x2d0   :  { %832 = vmin.xlane.f32.xlu0 %v792_v4  ;;  %v786_v60 = vmul.f32 %v778_v61, %v778_v61  ;;  %v802_v26 = vadd.f32 %v778_v61, %v726_v20  ;;  %v816_v7 = vsub.f32 %v792_v4, %v808_v36 }
 0x2d1   :  { %v758_v0 = vpop.permute.xlu1 %757 }
 0x2d2   :  { %v779_v10 = vsub.f32 %v2237_v1, %v758_v0  ;;  %v794_v22 = vadd.f32 %v786_v60, %v734_v3  ;;  %v810_v55 = vmul.f32 4e-06, %v802_v26  ;;  %v1805_v26 = vld [vmem:[%s2563_s2 + $0x128] sm:$0xff] }
 0x2d4   :  { %836 = vmin.xlane.f32.xlu0 %v794_v22  ;;  %v787_v24 = vmul.f32 %v779_v10, %v779_v10  ;;  %v803_v11 = vadd.f32 %v779_v10, %v727_v34  ;;  %v818_v54 = vsub.f32 %v794_v22, %v810_v55 }
 0x2d5   :  { %v766_v16 = vpop.permute.xlu1 %765 }
 0x2d6   :  { %v781_v21 = vsub.f32 %v2237_v1, %v766_v16  ;;  %v795_v53 = vadd.f32 %v787_v24, %v735_v32  ;;  %v811_v59 = vmul.f32 4e-06, %v803_v11  ;;  %v826_v56 = vadd.f32 8e-12, %v818_v54  ;;  %v1801_v32 = vld [vmem:[%s2563_s2 + $0x108] sm:$0xff]  ;;  %v1807_v24 = vld [vmem:[%s2563_s2 + $0x138] sm:$0xff] }
 0x2d7   :  { %v1806_v16 = vld [vmem:[%s2563_s2 + $0x130] sm:$0xff] }
 0x2d8   :  { %v805_v17 = vadd.f32 %v781_v21, %v729_v31  ;;  %838 = vmin.xlane.f32.xlu0 %v795_v53  ;;  %v789_v29 = vmul.f32 %v781_v21, %v781_v21  ;;  %v819_v18 = vsub.f32 %v795_v53, %v811_v59  ;;  %v863_v61 = vmin.f32 %v826_v56, %v830_v5  ;;  %v1803_v31 = vld [vmem:[%s2563_s2 + $0x118] sm:$0xff] }
 0x2d9   :  { %v774_v58 = vpop.permute.xlu1 %773 }
 0x2da   :  { %v813_v57 = vmul.f32 4e-06, %v805_v17  ;;  %v783_v43 = vsub.f32 %v2237_v1, %v774_v58  ;;  %v797_v35 = vadd.f32 %v789_v29, %v737_v40  ;;  %v824_v1 = vadd.f32 8e-12, %v816_v7  ;;  %v1799_v58 = vld [vmem:[%s2562_s1 + $0x8] sm:$0x3] }
 0x2db   :  { %v827_v6 = vadd.f32 8e-12, %v819_v18 }
 0x2dc   :  { %v807_v46 = vadd.f32 %v783_v43, %v731_v48  ;;  %v821_v62 = vsub.f32 %v797_v35, %v813_v57  ;;  %842 = vmin.xlane.f32.xlu0 %v797_v35  ;;  %v791_v15 = vmul.f32 %v783_v43, %v783_v43  ;;  %v861_v39 = vmin.f32 %v824_v1, %v828_v49 }
 0x2dd   :  { %v897_v43 = vadd.f32 1e-06, %v1799_v58 }
 0x2de   :  { %v815_v19 = vmul.f32 4e-06, %v807_v46  ;;  %v829_v41 = vadd.f32 8e-12, %v821_v62  ;;  %v799_v42 = vadd.f32 %v791_v15, %v739_v8 }
 0x2df   :  { %v2302_v7 = vrot.slane %v897_v43, %v1993_v28  ;;  %v2305_v46 = vrot.slane %v897_v43, %v1991_v27 }
 0x2e0   :  { %v823_v50 = vsub.f32 %v799_v42, %v815_v19  ;;  %846 = vmin.xlane.f32.xlu0 %v799_v42  ;;  %v862_v20 = vmin.f32 %v825_v44, %v829_v41 }
 0x2e2   :  { %v831_v51 = vadd.f32 8e-12, %v823_v50  ;;  %v865_v12 = vmin.f32 %v861_v39, %v862_v20 }
 0x2e4   :  { %v864_v4 = vmin.f32 %v827_v6, %v831_v51 }
 0x2e6   :  { %v866_v34 = vmin.f32 %v863_v61, %v864_v4 }
 0x2e8   :  { %v867_v47 = vmin.f32 %v865_v12, %v866_v34 }
 0x2ea   :  { %v868_v3 = vrot.slane %v867_v47, 4 }
 0x2ec   :  { %v869_v60 = vmin.f32 %v867_v47, %v868_v3 }
 0x2ee   :  { %v870_v0 = vrot.slane %v869_v60, 2 }
 0x2f0   :  { %v871_v10 = vmin.f32 %v869_v60, %v870_v0 }
 0x2f2   :  { %v872_v22 = vrot.slane %v871_v10, 1 }
 0x2f4   :  { %v873_v30 = vmin.f32 %v871_v10, %v872_v22 }
 0x2f6   :  { %904 = vperm.xlu0 %1850, %v1800_v25   ;;  %874 = vmax.xlane.f32.xlu1 %v873_v30 }
 0x2fa   :  { %1852 = vset.pattern.permute.xlu0 %v1903_v9 }
 0x2fb   :  { %963 = vperm.xlu0 %1852, %v1800_v25  }
 0x2ff   :  { %975 = vperm.xlu0 %1852, %v1803_v31  }
 0x303   :  { %983 = vperm.xlu0 %1852, %v1805_v26  }
 0x307   :  { %909 = vperm.xlu1 %1851, %v1801_v32   ;;  %991 = vperm.xlu0 %1852, %v1807_v24  }
 0x30b   :  { %914 = vperm.xlu1 %1851, %v1802_v33  }
 0x30f   :  { %919 = vperm.xlu1 %1851, %v1803_v31  }
 0x313   :  { %924 = vperm.xlu1 %1851, %v1804_v63  }
 0x317   :  { %929 = vperm.xlu1 %1851, %v1805_v26  }
 0x31b   :  { %934 = vperm.xlu1 %1851, %v1806_v16  }
 0x31f   :  { %939 = vperm.xlu1 %1851, %v1807_v24  }
 0x323   :  { %1853 = vset.pattern.permute.xlu1 %v1903_v9 }
 0x324   :  { %967 = vperm.xlu1 %1853, %v1801_v32  }
 0x328   :  { %971 = vperm.xlu1 %1853, %v1802_v33  }
 0x32c   :  { %979 = vperm.xlu1 %1853, %v1804_v63  }
 0x330   :  { %987 = vperm.xlu1 %1853, %v1806_v16  }
 0x334   :  { %1854 = vset.pattern.permute.xlu1 %v1902_v2 }
 0x341   :  { %v835_v53 = vpop.xlane.xlu1 %834 }
 0x34d   :  { %v841_v48 = vpop.xlane.xlu1 %840 }
 0x355   :  { %v845_v17 = vpop.xlane.xlu1 %844 }
 0x35d   :  { %v833_v11 = vpop.xlane.xlu0 %832 }
 0x35e   :  { %v848_v29 = vmax.f32 %v833_v11, %v841_v48 }
 0x361   :  { %v837_v21 = vpop.xlane.xlu0 %836 }
 0x362   :  { %v850_v45 = vmax.f32 %v837_v21, %v845_v17 }
 0x365   :  { %v839_v23 = vpop.xlane.xlu0 %838 }
 0x369   :  { %v843_v36 = vpop.xlane.xlu0 %842 }
 0x36a   :  { %v849_v55 = vmax.f32 %v835_v53, %v843_v36 }
 0x36c   :  { %v852_v59 = vmax.f32 %v848_v29, %v849_v55 }
 0x36d   :  { %v847_v40 = vpop.xlane.xlu0 %846 }
 0x36e   :  { %v851_v37 = vmax.f32 %v839_v23, %v847_v40 }
 0x370   :  { %v853_v57 = vmax.f32 %v850_v45, %v851_v37 }
 0x372   :  { %v854_v35 = vmax.f32 %v852_v59, %v853_v57 }
 0x374   :  { %v855_v38 = vrot.slane %v854_v35, 4 }
 0x375   :  { %v905_v8 = vpop.permute.xlu0 %904 }
 0x376   :  { %v856_v54 = vmax.f32 %v854_v35, %v855_v38  ;;  %v942_v15 = vsub.f32 %v2302_v7, %v905_v8 }
 0x378   :  { %v857_v62 = vrot.slane %v856_v54, 2  ;;  %v950_v19 = vmul.f32 %v942_v15, %v942_v15 }
 0x37a   :  { %v964_v14 = vpop.permute.xlu0 %963  ;;  %v858_v13 = vmax.f32 %v856_v54, %v857_v62 }
 0x37b   :  { %v994_v18 = vsub.f32 %v2305_v46, %v964_v14 }
 0x37c   :  { %v859_v42 = vrot.slane %v858_v13, 1 }
 0x37d   :  { %v1002_v41 = vmul.f32 %v994_v18, %v994_v18  ;;  %v1018_v43 = vadd.f32 %v994_v18, %v942_v15 }
 0x37e   :  { %v860_v1 = vmax.f32 %v858_v13, %v859_v42  ;;  %v976_v5 = vpop.permute.xlu0 %975 }
 0x37f   :  { %v2309_v44 = vadd.f32 %v1002_v41, %v950_v19  ;;  %v997_v20 = vsub.f32 %v2305_v46, %v976_v5 }
 0x381   :  { %1050 = vmin.xlane.f32.xlu1 %v2309_v44  ;;  %v1005_v61 = vmul.f32 %v997_v20, %v997_v20 }
 0x382   :  { %v984_v0 = vpop.permute.xlu0 %983 }
 0x383   :  { %v875_v56 = vpop.xlane.xlu1 %874  ;;  %v999_v22 = vsub.f32 %v2305_v46, %v984_v0 }
 0x384   :  { %v876_v50 = vmax.f32 %v860_v1, %v875_v56  ;;  %v1026_v56 = vmul.f32 4e-06, %v1018_v43 }
 0x385   :  { %v1007_v26 = vmul.f32 %v999_v22, %v999_v22 }
 0x386   :  { %1868 = vrsqrt.f32 %v876_v50  ;;  %vm879_vm6 = vcmp.eq.f32.partialorder %v876_v50, inf  ;;  %v882_v34 = vand.u32 2147483648, %v876_v50  ;;  %vm881_vm7 = vcmp.eq.f32.partialorder %v876_v50, 0.0  ;;  %v992_v33 = vpop.permute.xlu0 %991 }
 0x387   :  { %v910_v49 = vpop.permute.xlu1 %909  ;;  %v1001_v11 = vsub.f32 %v2305_v46, %v992_v33 }
 0x388   :  { %v943_v23 = vsub.f32 %v2302_v7, %v910_v49 }
 0x389   :  { %v1009_v48 = vmul.f32 %v1001_v11, %v1001_v11 }
 0x38a   :  { %v951_v45 = vmul.f32 %v943_v23, %v943_v23 }
 0x38b   :  { %v915_v6 = vpop.permute.xlu1 %914 }
 0x38c   :  { %v944_v29 = vsub.f32 %v2302_v7, %v915_v6 }
 0x38e   :  { %v952_v54 = vmul.f32 %v944_v29, %v944_v29 }
 0x38f   :  { %v920_v51 = vpop.permute.xlu1 %919 }
 0x390   :  { %v1869_v39 = vpop.eup %1868  ;;  %v945_v4 = vsub.f32 %v2302_v7, %v920_v51 }
 0x391   :  { %v878_v12 = vmul.f32 %v1869_v39, %v876_v50 }
 0x392   :  { %v953_v47 = vmul.f32 %v945_v4, %v945_v4  ;;  %v1021_v14 = vadd.f32 %v997_v20, %v945_v4 }
 0x393   :  { %v880_v3 = vsel %vm879_vm6, %v876_v50, %v878_v12  ;;  %v925_v60 = vpop.permute.xlu1 %924 }
 0x394   :  { %v883_v10 = vsel %vm881_vm7, %v882_v34, %v880_v3  ;;  %v2315_v25 = vadd.f32 %v1005_v61, %v953_v47  ;;  %v946_v38 = vsub.f32 %v2302_v7, %v925_v60  ;;  %v1029_v51 = vmul.f32 4e-06, %v1021_v14 }
 0x395   :  { %v884_v30 = vmul.f32 %v883_v10, %v2166_v52  ;;  %v1034_v47 = vsub.f32 %v2309_v44, %v1026_v56 }
 0x396   :  { %1056 = vmin.xlane.f32.xlu1 %v2315_v25  ;;  %v954_v18 = vmul.f32 %v946_v38, %v946_v38 }
 0x397   :  { %885 = vst [vmem:[#allocation4 + $0x3] sm:$0x1] %v884_v30  ;;  %v930_v31 = vpop.permute.xlu1 %929  ;;  %v1037_v30 = vsub.f32 %v2315_v25, %v1029_v51  ;;  %v1042_v44 = vadd.f32 8e-12, %v1034_v47  ;;  %v1811_v25 = vld [vmem:[%s2563_s2 + $0x150] sm:$0xff] }
 0x398   :  { %v947_v32 = vsub.f32 %v2302_v7, %v930_v31 }
 0x39a   :  { %v955_v24 = vmul.f32 %v947_v32, %v947_v32  ;;  %v1023_v13 = vadd.f32 %v999_v22, %v947_v32 }
 0x39b   :  { %v935_v63 = vpop.permute.xlu1 %934 }
 0x39c   :  { %v2320_v16 = vadd.f32 %v1007_v26, %v955_v24  ;;  %v948_v50 = vsub.f32 %v2302_v7, %v935_v63  ;;  %v1031_v39 = vmul.f32 4e-06, %v1023_v13  ;;  %v1816_v13 = vld [vmem:[%s2563_s2 + $0x178] sm:$0xff] }
 0x39e   :  { %1060 = vmin.xlane.f32.xlu1 %v2320_v16  ;;  %v956_v60 = vmul.f32 %v948_v50, %v948_v50  ;;  %v1039_v31 = vsub.f32 %v2320_v16, %v1031_v39 }
 0x39f   :  { %v940_v21 = vpop.permute.xlu1 %939 }
 0x3a0   :  { %v949_v53 = vsub.f32 %v2302_v7, %v940_v21  ;;  %v1047_v16 = vadd.f32 8e-12, %v1039_v31 }
 0x3a2   :  { %v957_v36 = vmul.f32 %v949_v53, %v949_v53  ;;  %v1025_v35 = vadd.f32 %v1001_v11, %v949_v53  ;;  %v1045_v53 = vadd.f32 8e-12, %v1037_v30 }
 0x3a3   :  { %v968_v55 = vpop.permute.xlu1 %967 }
 0x3a4   :  { %v995_v17 = vsub.f32 %v2305_v46, %v968_v55  ;;  %v1017_v40 = vadd.f32 %v1009_v48, %v957_v36  ;;  %v1033_v49 = vmul.f32 4e-06, %v1025_v35  ;;  %v1814_v35 = vld [vmem:[%s2563_s2 + $0x168] sm:$0xff] }
 0x3a6   :  { %1064 = vmin.xlane.f32.xlu1 %v1017_v40  ;;  %v1003_v37 = vmul.f32 %v995_v17, %v995_v17  ;;  %v1019_v8 = vadd.f32 %v995_v17, %v943_v23  ;;  %v1041_v3 = vsub.f32 %v1017_v40, %v1033_v49 }
 0x3a7   :  { %v972_v58 = vpop.permute.xlu1 %971 }
 0x3a8   :  { %v996_v59 = vsub.f32 %v2305_v46, %v972_v58  ;;  %v1011_v57 = vadd.f32 %v1003_v37, %v951_v45  ;;  %v1027_v5 = vmul.f32 4e-06, %v1019_v8  ;;  %v1049_v63 = vadd.f32 8e-12, %v1041_v3  ;;  %v1812_v37 = vld [vmem:[%s2563_s2 + $0x158] sm:$0xff] }
 0x3a9   :  { %v1808_v3 = vld [vmem:[%s2562_s1 + $0xa] sm:$0x3] }
 0x3aa   :  { %1052 = vmin.xlane.f32.xlu0 %v1011_v57  ;;  %v1004_v62 = vmul.f32 %v996_v59, %v996_v59  ;;  %v1020_v41 = vadd.f32 %v996_v59, %v944_v29  ;;  %v1035_v0 = vsub.f32 %v1011_v57, %v1027_v5  ;;  %v1082_v55 = vmin.f32 %v1045_v53, %v1049_v63  ;;  %v1813_v59 = vld [vmem:[%s2563_s2 + $0x160] sm:$0xff] }
 0x3ab   :  { %v980_v19 = vpop.permute.xlu1 %979 }
 0x3ac   :  { %v998_v42 = vsub.f32 %v2305_v46, %v980_v19  ;;  %v1012_v1 = vadd.f32 %v1004_v62, %v952_v54  ;;  %v1028_v12 = vmul.f32 4e-06, %v1020_v41  ;;  %v1043_v11 = vadd.f32 8e-12, %v1035_v0  ;;  %v1815_v54 = vld [vmem:[%s2563_s2 + $0x170] sm:$0xff]  ;;  %v1810_v19 = vld [vmem:[%s2563_s2 + $0x148] sm:$0xff] }
 0x3ae   :  { %v1022_v15 = vadd.f32 %v998_v42, %v946_v38  ;;  %1054 = vmin.xlane.f32.xlu0 %v1012_v1  ;;  %v1006_v6 = vmul.f32 %v998_v42, %v998_v42  ;;  %v1036_v26 = vsub.f32 %v1012_v1, %v1028_v12  ;;  %v1080_v17 = vmin.f32 %v1043_v11, %v1047_v16 }
 0x3af   :  { %v988_v61 = vpop.permute.xlu1 %987 }
 0x3b0   :  { %v1030_v20 = vmul.f32 4e-06, %v1022_v15  ;;  %v1000_v4 = vsub.f32 %v2305_v46, %v988_v61  ;;  %v1014_v34 = vadd.f32 %v1006_v6, %v954_v18  ;;  %v1809_v46 = vld [vmem:[%s2563_s2 + $0x140] sm:$0xff]  ;;  %v1044_v23 = vadd.f32 8e-12, %v1036_v26 }
 0x3b2   :  { %v1024_v7 = vadd.f32 %v1000_v4, %v948_v50  ;;  %1058 = vmin.xlane.f32.xlu0 %v1014_v34  ;;  %v1038_v10 = vsub.f32 %v1014_v34, %v1030_v20  ;;  %v1008_v22 = vmul.f32 %v1000_v4, %v1000_v4 }
 0x3b4   :  { %v1032_v32 = vmul.f32 4e-06, %v1024_v7  ;;  %v1046_v24 = vadd.f32 8e-12, %v1038_v10  ;;  %v1016_v33 = vadd.f32 %v1008_v22, %v956_v60  ;;  %v1115_v7 = vadd.f32 1e-06, %v1808_v3 }
 0x3b6   :  { %1062 = vmin.xlane.f32.xlu0 %v1016_v33  ;;  %v1040_v21 = vsub.f32 %v1016_v33, %v1032_v32  ;;  %v1079_v48 = vmin.f32 %v1042_v44, %v1046_v24  ;;  %v2367_v31 = vrot.slane %v1115_v7, %v1993_v28  ;;  %v1179_v24 = vrot.slane %v1115_v7, %v1991_v27 }
 0x3b7   :  { %1122 = vperm.xlu1 %1854, %v1809_v46  }
 0x3b8   :  { %v1048_v36 = vadd.f32 8e-12, %v1040_v21  ;;  %v1083_v29 = vmin.f32 %v1079_v48, %v1080_v17 }
 0x3ba   :  { %v1081_v40 = vmin.f32 %v1044_v23, %v1048_v36 }
 0x3bb   :  { %1132 = vperm.xlu1 %1854, %v1811_v25  }
 0x3bc   :  { %v1084_v45 = vmin.f32 %v1081_v40, %v1082_v55 }
 0x3be   :  { %v1085_v58 = vmin.f32 %v1083_v29, %v1084_v45 }
 0x3bf   :  { %1137 = vperm.xlu1 %1854, %v1812_v37  }
 0x3c0   :  { %v1086_v57 = vrot.slane %v1085_v58, 4 }
 0x3c2   :  { %v1087_v43 = vmin.f32 %v1085_v58, %v1086_v57 }
 0x3c3   :  { %1142 = vperm.xlu1 %1854, %v1813_v59  }
 0x3c4   :  { %v1088_v38 = vrot.slane %v1087_v43, 2 }
 0x3c6   :  { %v1089_v8 = vmin.f32 %v1087_v43, %v1088_v38 }
 0x3c7   :  { %1147 = vperm.xlu1 %1854, %v1814_v35  }
 0x3c8   :  { %v1090_v62 = vrot.slane %v1089_v8, 1 }
 0x3ca   :  { %v1091_v14 = vmin.f32 %v1089_v8, %v1090_v62 }
 0x3cb   :  { %1152 = vperm.xlu1 %1854, %v1815_v54  }
 0x3cc   :  { %1092 = vmax.xlane.f32.xlu0 %v1091_v14 }
 0x3cf   :  { %1157 = vperm.xlu1 %1854, %v1816_v13  }
 0x3d3   :  { %1855 = vset.pattern.permute.xlu1 %v1903_v9 }
 0x3d4   :  { %1181 = vperm.xlu1 %1855, %v1809_v46  }
 0x3d8   :  { %1185 = vperm.xlu1 %1855, %v1810_v19  }
 0x3dc   :  { %1193 = vperm.xlu1 %1855, %v1812_v37  }
 0x3e0   :  { %1197 = vperm.xlu1 %1855, %v1813_v59  }
 0x3e2   :  { %1189 = vperm.xlu0 %1852, %v1811_v25  }
 0x3e4   :  { %1205 = vperm.xlu1 %1855, %v1815_v54  }
 0x3e6   :  { %1201 = vperm.xlu0 %1852, %v1814_v35  }
 0x3e8   :  { %1857 = vset.pattern.permute.xlu1 %v1902_v2 }
 0x3ea   :  { %1209 = vperm.xlu0 %1852, %v1816_v13  }
 0x3ee   :  { %1856 = vset.pattern.permute.xlu0 %v1902_v2 }
 0x3ef   :  { %1127 = vperm.xlu0 %1856, %v1810_v19  }
 0x40e   :  { %v1051_v41 = vpop.xlane.xlu1 %1050 }
 0x423   :  { %v1057_v42 = vpop.xlane.xlu1 %1056 }
 0x42b   :  { %v1061_v1 = vpop.xlane.xlu1 %1060 }
 0x433   :  { %v1065_v56 = vpop.xlane.xlu1 %1064 }
 0x434   :  { %v1069_v12 = vmax.f32 %v1057_v42, %v1065_v56 }
 0x437   :  { %v1053_v50 = vpop.xlane.xlu0 %1052  ;;  %v1123_v49 = vpop.permute.xlu1 %1122 }
 0x438   :  { %v1067_v20 = vmax.f32 %v1053_v50, %v1061_v1  ;;  %v1160_v46 = vsub.f32 %v2367_v31, %v1123_v49 }
 0x43a   :  { %v1168_v21 = vmul.f32 %v1160_v46, %v1160_v46 }
 0x43b   :  { %v1055_v5 = vpop.xlane.xlu0 %1054  ;;  %v1133_v15 = vpop.permute.xlu1 %1132 }
 0x43c   :  { %v1162_v58 = vsub.f32 %v2367_v31, %v1133_v15 }
 0x43e   :  { %v1170_v54 = vmul.f32 %v1162_v58, %v1162_v58 }
 0x43f   :  { %v1059_v18 = vpop.xlane.xlu0 %1058  ;;  %v1138_v6 = vpop.permute.xlu1 %1137 }
 0x440   :  { %v1066_v51 = vmax.f32 %v1051_v41, %v1059_v18  ;;  %v1163_v55 = vsub.f32 %v2367_v31, %v1138_v6 }
 0x442   :  { %v1070_v34 = vmax.f32 %v1066_v51, %v1067_v20  ;;  %v1171_v29 = vmul.f32 %v1163_v55, %v1163_v55 }
 0x443   :  { %v1063_v39 = vpop.xlane.xlu0 %1062  ;;  %v1143_v61 = vpop.permute.xlu1 %1142 }
 0x444   :  { %v1068_v4 = vmax.f32 %v1055_v5, %v1063_v39  ;;  %v1164_v59 = vsub.f32 %v2367_v31, %v1143_v61 }
 0x446   :  { %v1071_v47 = vmax.f32 %v1068_v4, %v1069_v12  ;;  %v1172_v14 = vmul.f32 %v1164_v59, %v1164_v59 }
 0x447   :  { %v1148_v60 = vpop.permute.xlu1 %1147 }
 0x448   :  { %v1072_v0 = vmax.f32 %v1070_v34, %v1071_v47  ;;  %v1165_v57 = vsub.f32 %v2367_v31, %v1148_v60 }
 0x44a   :  { %v1073_v10 = vrot.slane %v1072_v0, 4  ;;  %v1173_v13 = vmul.f32 %v1165_v57, %v1165_v57 }
 0x44b   :  { %v1153_v22 = vpop.permute.xlu1 %1152 }
 0x44c   :  { %v1074_v30 = vmax.f32 %v1072_v0, %v1073_v10  ;;  %v1166_v38 = vsub.f32 %v2367_v31, %v1153_v22 }
 0x44e   :  { %v1075_v26 = vrot.slane %v1074_v30, 2  ;;  %v1174_v56 = vmul.f32 %v1166_v38, %v1166_v38 }
 0x44f   :  { %v1158_v32 = vpop.permute.xlu1 %1157 }
 0x450   :  { %v1076_v33 = vmax.f32 %v1074_v30, %v1075_v26  ;;  %v1167_v50 = vsub.f32 %v2367_v31, %v1158_v32 }
 0x452   :  { %v1077_v11 = vrot.slane %v1076_v33, 1  ;;  %v1175_v10 = vmul.f32 %v1167_v50, %v1167_v50 }
 0x453   :  { %v1182_v44 = vpop.permute.xlu1 %1181 }
 0x454   :  { %v1212_v63 = vsub.f32 %v1179_v24, %v1182_v44  ;;  %v1078_v16 = vmax.f32 %v1076_v33, %v1077_v11 }
 0x456   :  { %v1220_v53 = vmul.f32 %v1212_v63, %v1212_v63  ;;  %v1236_v49 = vadd.f32 %v1212_v63, %v1160_v46 }
 0x457   :  { %v1186_v25 = vpop.permute.xlu1 %1185 }
 0x458   :  { %v2371_v23 = vadd.f32 %v1220_v53, %v1168_v21  ;;  %v1244_v22 = vmul.f32 4e-06, %v1236_v49  ;;  %v1213_v32 = vsub.f32 %v1179_v24, %v1186_v25 }
 0x459   :  { %v1093_v48 = vpop.xlane.xlu0 %1092 }
 0x45a   :  { %v1094_v36 = vmax.f32 %v1078_v16, %v1093_v48  ;;  %1268 = vmin.xlane.f32.xlu1 %v2371_v23 }
 0x45b   :  { %v1194_v17 = vpop.permute.xlu1 %1193 }
 0x45c   :  { %1870 = vrsqrt.f32 %v1094_v36  ;;  %v1215_v40 = vsub.f32 %v1179_v24, %v1194_v17  ;;  %vm1097_vm8 = vcmp.eq.f32.partialorder %v1094_v36, inf  ;;  %vm1099_vm9 = vcmp.eq.f32.partialorder %v1094_v36, 0.0 }
 0x45d   :  { %v1100_v18 = vand.u32 2147483648, %v1094_v36 }
 0x45e   :  { %v1223_v45 = vmul.f32 %v1215_v40, %v1215_v40  ;;  %v1239_v6 = vadd.f32 %v1215_v40, %v1163_v55 }
 0x45f   :  { %v1198_v37 = vpop.permute.xlu1 %1197 }
 0x460   :  { %v2378_v35 = vadd.f32 %v1223_v45, %v1171_v29  ;;  %v1216_v62 = vsub.f32 %v1179_v24, %v1198_v37  ;;  %v1247_v33 = vmul.f32 4e-06, %v1239_v6  ;;  %v1221_v45 = vmul.f32 %v1213_v32, %v1213_v32 }
 0x461   :  { %v1190_v43 = vpop.permute.xlu0 %1189 }
 0x462   :  { %1274 = vmin.xlane.f32.xlu1 %v2378_v35  ;;  %v1214_v19 = vsub.f32 %v1179_v24, %v1190_v43  ;;  %v1224_v51 = vmul.f32 %v1216_v62, %v1216_v62  ;;  %v1240_v39 = vadd.f32 %v1216_v62, %v1164_v59  ;;  %v1252_v43 = vsub.f32 %v2371_v23, %v1244_v22  ;;  %v1819_v22 = vld [vmem:[%s2563_s2 + $0x188] sm:$0xff] }
 0x463   :  { %v1206_v8 = vpop.permute.xlu1 %1205 }
 0x464   :  { %v1218_v41 = vsub.f32 %v1179_v24, %v1206_v8  ;;  %v1222_v20 = vmul.f32 %v1214_v19, %v1214_v19  ;;  %v1238_v60 = vadd.f32 %v1214_v19, %v1162_v58  ;;  %v1248_v63 = vmul.f32 4e-06, %v1240_v39 }
 0x465   :  { %v1202_v42 = vpop.permute.xlu0 %1201  ;;  %v1232_v21 = vadd.f32 %v1224_v51, %v1172_v14  ;;  %v1818_v51 = vld [vmem:[%s2563_s2 + $0x180] sm:$0xff] }
 0x466   :  { %v1871_v1 = vpop.eup %1870  ;;  %v1217_v5 = vsub.f32 %v1179_v24, %v1202_v42  ;;  %v1226_v4 = vmul.f32 %v1218_v41, %v1218_v41  ;;  %v1242_v34 = vadd.f32 %v1218_v41, %v1166_v38  ;;  %v1246_v16 = vmul.f32 4e-06, %v1238_v60  ;;  %v1822_v60 = vld [vmem:[%s2563_s2 + $0x1a0] sm:$0xff] }
 0x467   :  { %v1096_v15 = vmul.f32 %v1871_v1, %v1094_v36  ;;  %v1230_v17 = vadd.f32 %v1222_v20, %v1170_v54  ;;  %v1256_v59 = vsub.f32 %v1232_v21, %v1248_v63  ;;  %v1260_v42 = vadd.f32 8e-12, %v1252_v43  ;;  %v1831_v63 = vld [vmem:[%s2563_s2 + $0x1e0] sm:$0xff] }
 0x468   :  { %v1225_v61 = vmul.f32 %v1217_v5, %v1217_v5  ;;  %v1241_v26 = vadd.f32 %v1217_v5, %v1165_v57  ;;  %v1250_v11 = vmul.f32 4e-06, %v1242_v34  ;;  %v1234_v53 = vadd.f32 %v1226_v4, %v1174_v56  ;;  %v1821_v34 = vld [vmem:[%s2563_s2 + $0x198] sm:$0xff] }
 0x469   :  { %v1098_v12 = vsel %vm1097_vm8, %v1094_v36, %v1096_v15  ;;  %v1210_v47 = vpop.permute.xlu0 %1209  ;;  %v1254_v38 = vsub.f32 %v1230_v17, %v1246_v16 }
 0x46a   :  { %v1101_v3 = vsel %vm1099_vm9, %v1100_v18, %v1098_v12  ;;  %v1219_v0 = vsub.f32 %v1179_v24, %v1210_v47  ;;  %v1233_v7 = vadd.f32 %v1225_v61, %v1173_v13  ;;  %v1249_v40 = vmul.f32 4e-06, %v1241_v26  ;;  %v1820_v12 = vld [vmem:[%s2563_s2 + $0x190] sm:$0xff]  ;;  %v1830_v26 = vld [vmem:[%s2563_s2 + $0x1d8] sm:$0xff] }
 0x46b   :  { %v1102_v30 = vmul.f32 %v1101_v3, %v2166_v52  ;;  %v1255_v24 = vsub.f32 %v2378_v35, %v1247_v33  ;;  %v1258_v57 = vsub.f32 %v1234_v53, %v1250_v11  ;;  %v1834_v33 = vld [vmem:[%s2563_s2 + $0x1f8] sm:$0xff]  ;;  %v1833_v11 = vld [vmem:[%s2563_s2 + $0x1f0] sm:$0xff] }
 0x46c   :  { %v1227_v46 = vmul.f32 %v1219_v0, %v1219_v0  ;;  %v1243_v44 = vadd.f32 %v1219_v0, %v1167_v50  ;;  %1278 = vmin.xlane.f32.xlu1 %v1233_v7  ;;  %v1257_v8 = vsub.f32 %v1233_v7, %v1249_v40  ;;  %v1262_v50 = vadd.f32 8e-12, %v1254_v38  ;;  %v1823_v0 = vld [vmem:[%s2563_s2 + $0x1a8] sm:$0xff]  ;;  %v1824_v7 = vld [vmem:[%s2563_s2 + $0x1b0] sm:$0xff] }
 0x46d   :  { %1103 = vst [vmem:[#allocation4 + $0x4] sm:$0x1] %v1102_v30  ;;  %v1263_v54 = vadd.f32 8e-12, %v1255_v24  ;;  %v1266_v41 = vadd.f32 8e-12, %v1258_v57 }
 0x46e   :  { %v1251_v48 = vmul.f32 4e-06, %v1243_v44  ;;  %v1128_v36 = vpop.permute.xlu0 %1127  ;;  %v1235_v55 = vadd.f32 %v1227_v46, %v1175_v10  ;;  %v1265_v35 = vadd.f32 8e-12, %v1257_v8  ;;  %v1825_v10 = vld [vmem:[%s2563_s2 + $0x1b8] sm:$0xff]  ;;  %v1827_v30 = vld [vmem:[%s2563_s2 + $0x1c0] sm:$0xff] }
 0x46f   :  { %v1161_v29 = vsub.f32 %v2367_v31, %v1128_v36  ;;  %v1264_v31 = vadd.f32 8e-12, %v1256_v59  ;;  %v1299_v15 = vmin.f32 %v1262_v50, %v1266_v41  ;;  %v1828_v46 = vld [vmem:[%s2563_s2 + $0x1c8] sm:$0xff]  ;;  %v1829_v44 = vld [vmem:[%s2563_s2 + $0x1d0] sm:$0xff] }
 0x470   :  { %v1259_v25 = vsub.f32 %v1235_v55, %v1251_v48  ;;  %1282 = vmin.xlane.f32.xlu1 %v1235_v55  ;;  %v1817_v59 = vld [vmem:[%s2562_s1 + $0xc] sm:$0x3] }
 0x471   :  { %v1169_v37 = vmul.f32 %v1161_v29, %v1161_v29  ;;  %v1237_v58 = vadd.f32 %v1213_v32, %v1161_v29  ;;  %v1297_v5 = vmin.f32 %v1260_v42, %v1264_v31  ;;  %v1832_v32 = vld [vmem:[%s2563_s2 + $0x1e8] sm:$0xff] }
 0x472   :  { %v1267_v14 = vadd.f32 8e-12, %v1259_v25 }
 0x473   :  { %v1245_v62 = vmul.f32 4e-06, %v1237_v58  ;;  %v1229_v13 = vadd.f32 %v1221_v45, %v1169_v37 }
 0x474   :  { %v1300_v1 = vmin.f32 %v1263_v54, %v1267_v14 }
 0x475   :  { %1270 = vmin.xlane.f32.xlu0 %v1229_v13  ;;  %v1253_v19 = vsub.f32 %v1229_v13, %v1245_v62  ;;  %v1333_v62 = vadd.f32 1e-06, %v1817_v59 }
 0x476   :  { %v1302_v18 = vmin.f32 %v1299_v15, %v1300_v1 }
 0x477   :  { %v1261_v56 = vadd.f32 8e-12, %v1253_v19  ;;  %v2447_v19 = vrot.slane %v1333_v62, %v1993_v28  ;;  %v2450_v42 = vrot.slane %v1333_v62, %v1991_v27 }
 0x479   :  { %v1298_v49 = vmin.f32 %v1261_v56, %v1265_v35  ;;  %1272 = vmin.xlane.f32.xlu0 %v1230_v17 }
 0x47b   :  { %v1301_v23 = vmin.f32 %v1297_v5, %v1298_v49 }
 0x47d   :  { %1276 = vmin.xlane.f32.xlu0 %v1232_v21  ;;  %v1303_v6 = vmin.f32 %v1301_v23, %v1302_v18 }
 0x47f   :  { %v1304_v39 = vrot.slane %v1303_v6, 4 }
 0x481   :  { %1340 = vperm.xlu1 %1857, %v1818_v51   ;;  %1280 = vmin.xlane.f32.xlu0 %v1234_v53  ;;  %v1305_v61 = vmin.f32 %v1303_v6, %v1304_v39 }
 0x483   :  { %v1306_v20 = vrot.slane %v1305_v61, 2 }
 0x485   :  { %1350 = vperm.xlu1 %1857, %v1820_v12   ;;  %v1307_v4 = vmin.f32 %v1305_v61, %v1306_v20 }
 0x487   :  { %v1308_v47 = vrot.slane %v1307_v4, 1 }
 0x489   :  { %1355 = vperm.xlu1 %1857, %v1821_v34   ;;  %v1309_v3 = vmin.f32 %v1307_v4, %v1308_v47 }
 0x48b   :  { %1310 = vmax.xlane.f32.xlu0 %v1309_v3 }
 0x48d   :  { %1360 = vperm.xlu1 %1857, %v1822_v60  }
 0x491   :  { %1365 = vperm.xlu1 %1857, %v1823_v0  }
 0x495   :  { %1370 = vperm.xlu1 %1857, %v1824_v7  }
 0x499   :  { %1375 = vperm.xlu1 %1857, %v1825_v10  }
 0x49d   :  { %1858 = vset.pattern.permute.xlu1 %v1903_v9 }
 0x49e   :  { %1399 = vperm.xlu1 %1858, %v1818_v51  }
 0x4a1   :  { %1345 = vperm.xlu0 %1856, %v1819_v22  }
 0x4a2   :  { %1407 = vperm.xlu1 %1858, %v1820_v12  }
 0x4a5   :  { %1558 = vperm.xlu0 %1856, %v1827_v30  }
 0x4a6   :  { %1411 = vperm.xlu1 %1858, %v1821_v34  }
 0x4a9   :  { %1573 = vperm.xlu0 %1856, %v1830_v26  }
 0x4aa   :  { %1419 = vperm.xlu1 %1858, %v1823_v0  }
 0x4ad   :  { %1583 = vperm.xlu0 %1856, %v1832_v32  }
 0x4ae   :  { %1427 = vperm.xlu1 %1858, %v1825_v10  }
 0x4b1   :  { %1593 = vperm.xlu0 %1856, %v1834_v33  }
 0x4b2   :  { %1859 = vset.pattern.permute.xlu1 %v1902_v2 }
 0x4b3   :  { %1563 = vperm.xlu1 %1859, %v1828_v46  }
 0x4b5   :  { %1860 = vset.pattern.permute.xlu0 %v1903_v9 }
 0x4b6   :  { %1403 = vperm.xlu0 %1860, %v1819_v22  }
 0x4b7   :  { %1568 = vperm.xlu1 %1859, %v1829_v44  }
 0x4ba   :  { %1415 = vperm.xlu0 %1860, %v1822_v60  }
 0x4bb   :  { %1578 = vperm.xlu1 %1859, %v1831_v63  }
 0x4be   :  { %1423 = vperm.xlu0 %1860, %v1824_v7  }
 0x4bf   :  { %1588 = vperm.xlu1 %1859, %v1833_v11  }
 0x4c2   :  { %1621 = vperm.xlu0 %1860, %v1828_v46  }
 0x4c3   :  { %1861 = vset.pattern.permute.xlu1 %v1903_v9 }
 0x4c4   :  { %1617 = vperm.xlu1 %1861, %v1827_v30  }
 0x4c6   :  { %1633 = vperm.xlu0 %1860, %v1831_v63  }
 0x4c8   :  { %1625 = vperm.xlu1 %1861, %v1829_v44  }
 0x4ca   :  { %1641 = vperm.xlu0 %1860, %v1833_v11  }
 0x4cc   :  { %1629 = vperm.xlu1 %1861, %v1830_v26  }
 0x4d0   :  { %1637 = vperm.xlu1 %1861, %v1832_v32  }
 0x4d4   :  { %1645 = vperm.xlu1 %1861, %v1834_v33  }
 0x4e7   :  { %v1269_v2 = vpop.xlane.xlu1 %1268 }
 0x4ef   :  { %v1275_v21 = vpop.xlane.xlu1 %1274 }
 0x4f9   :  { %v1279_v53 = vpop.xlane.xlu1 %1278 }
 0x4fd   :  { %v1283_v16 = vpop.xlane.xlu1 %1282 }
 0x4fe   :  { %v1287_v25 = vmax.f32 %v1275_v21, %v1283_v16 }
 0x501   :  { %v1341_v48 = vpop.permute.xlu1 %1340 }
 0x502   :  { %v1271_v36 = vpop.xlane.xlu0 %1270  ;;  %v1378_v1 = vsub.f32 %v2447_v19, %v1341_v48 }
 0x503   :  { %v1285_v37 = vmax.f32 %v1271_v36, %v1279_v53 }
 0x504   :  { %v1386_v23 = vmul.f32 %v1378_v1, %v1378_v1 }
 0x505   :  { %v1351_v55 = vpop.permute.xlu1 %1350 }
 0x506   :  { %v1273_v17 = vpop.xlane.xlu0 %1272  ;;  %v1380_v18 = vsub.f32 %v2447_v19, %v1351_v55 }
 0x508   :  { %v1388_v4 = vmul.f32 %v1380_v18, %v1380_v18 }
 0x509   :  { %v1356_v40 = vpop.permute.xlu1 %1355 }
 0x50a   :  { %v1277_v29 = vpop.xlane.xlu0 %1276  ;;  %v1381_v34 = vsub.f32 %v2447_v19, %v1356_v40 }
 0x50b   :  { %v1284_v45 = vmax.f32 %v1269_v2, %v1277_v29 }
 0x50c   :  { %v1389_v10 = vmul.f32 %v1381_v34, %v1381_v34 }
 0x50d   :  { %v2439_v24 = vpop.permute.xlu1 %1360  ;;  %v1288_v57 = vmax.f32 %v1284_v45, %v1285_v37 }
 0x50e   :  { %v1281_v9 = vpop.xlane.xlu0 %1280 }
 0x50f   :  { %v1286_v58 = vmax.f32 %v1273_v17, %v1281_v9 }
 0x511   :  { %v1289_v43 = vmax.f32 %v1286_v58, %v1287_v25  ;;  %v1366_v38 = vpop.permute.xlu1 %1365 }
 0x512   :  { %v1383_v26 = vsub.f32 %v2447_v19, %v1366_v38 }
 0x513   :  { %v1290_v8 = vmax.f32 %v1288_v57, %v1289_v43  ;;  %v1826_v57 = vld [vmem:[%s2562_s1 + $0xe] sm:$0x3]  ;;  %s1904_s1 = smov [#allocation4]  }
 0x514   :  { %v1391_v21 = vmul.f32 %v1383_v26, %v1383_v26  ;;  %s1764_s18 = sshll.u32 %s1904_s1, 4  ;;  %s1765_s18 = int_to_ptr.vmem [resolvable:$true] %s1764_s18 }
 0x515   :  { %v1291_v14 = vrot.slane %v1290_v8, 4  ;;  %v2444_v13 = vpop.permute.xlu1 %1370  ;;  %s1878_s19 = scalar_lea.vmem %s1765_s18, 128  ;;  %p1883_p1 = scmp.lt.s32.totalorder %s1765_s18, %s1765_s18 }
 0x516   :  { %p1879_p0 = scmp.ne.s32.totalorder %s1765_s18, %s1878_s19  ;;  %p1884_p2 = scmp.lt.s32.totalorder %s1878_s19, %s1878_s19 }
 0x517   :  { %v1292_v54 = vmax.f32 %v1290_v8, %v1291_v14  ;;  %v1551_v14 = vadd.f32 1e-06, %v1826_v57 }
 0x518   :  { %v1311_v56 = vpop.xlane.xlu0 %1310  ;;  %p1885_p3 = por %p1884_p2, %p1883_p1 }
 0x519   :  { %v1293_v31 = vrot.slane %v1292_v54, 2  ;;  %v1376_v41 = vpop.permute.xlu1 %1375 }
 0x51a   :  { %v1385_v44 = vsub.f32 %v2447_v19, %v1376_v41  ;;  %p1886_p4 = pnand %p1885_p3, %p1879_p0 }
 0x51b   :  { %v1294_v35 = vmax.f32 %v1292_v54, %v1293_v31  ;;  %v1382_v54 = vsub.f32 %v2447_v19, %v2439_v24 }
 0x51c   :  { %v1393_v40 = vmul.f32 %v1385_v44, %v1385_v44 }
 0x51d   :  { %v1295_v50 = vrot.slane %v1294_v35, 1  ;;  %v1400_v49 = vpop.permute.xlu1 %1399  ;;  %v1390_v24 = vmul.f32 %v1382_v54, %v1382_v54 }
 0x51e   :  { %v1430_v5 = vsub.f32 %v2450_v42, %v1400_v49 }
 0x51f   :  { %v1296_v15 = vmax.f32 %v1294_v35, %v1295_v50 }
 0x520   :  { %v1438_v6 = vmul.f32 %v1430_v5, %v1430_v5  ;;  %v1346_v51 = vpop.permute.xlu0 %1345  ;;  %v1454_v62 = vadd.f32 %v1430_v5, %v1378_v1  ;;  %v1384_v1 = vsub.f32 %v2447_v19, %v2444_v13 }
 0x521   :  { %v1312_v39 = vmax.f32 %v1296_v15, %v1311_v56  ;;  %v1408_v61 = vpop.permute.xlu1 %1407  ;;  %v1379_v59 = vsub.f32 %v2447_v19, %v1346_v51 }
 0x522   :  { %v1432_v12 = vsub.f32 %v2450_v42, %v1408_v61  ;;  %v2456_v20 = vadd.f32 %v1438_v6, %v1386_v23  ;;  %v1462_v5 = vmul.f32 4e-06, %v1454_v62  ;;  %v2501_v61 = vrot.slane %v1551_v14, %v1993_v28 }
 0x523   :  { %1872 = vrsqrt.f32 %v1312_v39  ;;  %vm1315_vm10 = vcmp.eq.f32.partialorder %v1312_v39, inf  ;;  %v1318_v36 = vand.u32 2147483648, %v1312_v39  ;;  %vm1317_vm11 = vcmp.eq.f32.partialorder %v1312_v39, 0.0 }
 0x524   :  { %v1440_v47 = vmul.f32 %v1432_v12, %v1432_v12  ;;  %v2459_v3 = vpop.permute.xlu0 %1558  ;;  %1486 = vmin.xlane.f32.xlu0 %v2456_v20  ;;  %v1387_v31 = vmul.f32 %v1379_v59, %v1379_v59  ;;  %v1456_v41 = vadd.f32 %v1432_v12, %v1380_v18  ;;  %v1392_v28 = vmul.f32 %v1384_v1, %v1384_v1 }
 0x525   :  { %v1412_v60 = vpop.permute.xlu1 %1411 }
 0x526   :  { %v1433_v0 = vsub.f32 %v2450_v42, %v1412_v60  ;;  %v2463_v7 = vadd.f32 %v1440_v47, %v1388_v4  ;;  %v1464_v18 = vmul.f32 4e-06, %v1456_v41 }
 0x528   :  { %v1441_v22 = vmul.f32 %v1433_v0, %v1433_v0  ;;  %v2465_v30 = vpop.permute.xlu0 %1573  ;;  %1490 = vmin.xlane.f32.xlu0 %v2463_v7  ;;  %v1457_v56 = vadd.f32 %v1433_v0, %v1381_v34 }
 0x529   :  { %v1420_v32 = vpop.permute.xlu1 %1419 }
 0x52a   :  { %v1435_v33 = vsub.f32 %v2450_v42, %v1420_v32  ;;  %v2470_v46 = vadd.f32 %v1441_v22, %v1389_v10  ;;  %v1465_v34 = vmul.f32 4e-06, %v1457_v56  ;;  %v2504_v10 = vrot.slane %v1551_v14, %v1991_v27 }
 0x52c   :  { %v1443_v63 = vmul.f32 %v1435_v33, %v1435_v33  ;;  %v2473_v11 = vpop.permute.xlu0 %1583  ;;  %1492 = vmin.xlane.f32.xlu0 %v2470_v46  ;;  %v1459_v23 = vadd.f32 %v1435_v33, %v1383_v26  ;;  %v2509_v33 = vsub.f32 %v2501_v61, %v2459_v3 }
 0x52d   :  { %v1873_v2 = vpop.eup %1872  ;;  %v1428_v53 = vpop.permute.xlu1 %1427 }
 0x52e   :  { %v1314_v16 = vmul.f32 %v1873_v2, %v1312_v39  ;;  %v1437_v48 = vsub.f32 %v2450_v42, %v1428_v53  ;;  %v2477_v55 = vadd.f32 %v1443_v63, %v1391_v21  ;;  %v1467_v22 = vmul.f32 4e-06, %v1459_v23 }
 0x52f   :  { %v1472_v63 = vsub.f32 %v2463_v7, %v1464_v18  ;;  %v1473_v53 = vsub.f32 %v2470_v46, %v1465_v34 }
 0x530   :  { %v1316_v17 = vsel %vm1315_vm10, %v1312_v39, %v1314_v16  ;;  %v1445_v29 = vmul.f32 %v1437_v48, %v1437_v48  ;;  %v2479_v45 = vpop.permute.xlu0 %1593  ;;  %1496 = vmin.xlane.f32.xlu0 %v2477_v55  ;;  %v1461_v50 = vadd.f32 %v1437_v48, %v1385_v44  ;;  %v1470_v44 = vsub.f32 %v2456_v20, %v1462_v5 }
 0x531   :  { %v1319_v9 = vsel %vm1317_vm11, %v1318_v36, %v1316_v17  ;;  %v1475_v17 = vsub.f32 %v2477_v55, %v1467_v22  ;;  %v1480_v55 = vadd.f32 8e-12, %v1472_v63  ;;  %v1481_v62 = vadd.f32 8e-12, %v1473_v53 }
 0x532   :  { %v1320_v25 = vmul.f32 %v1319_v9, %v2166_v52  ;;  %v1564_v37 = vpop.permute.xlu1 %1563  ;;  %v2483_v58 = vadd.f32 %v1445_v29, %v1393_v40  ;;  %v1469_v47 = vmul.f32 4e-06, %v1461_v50  ;;  %v1604_v9 = vmul.f32 %v2509_v33, %v2509_v33 }
 0x533   :  { %v1597_v16 = vsub.f32 %v2501_v61, %v1564_v37  ;;  %v1483_v14 = vadd.f32 8e-12, %v1475_v17 }
 0x534   :  { %1321 = vst [vmem:[#allocation4 + $0x5] sm:$0x1] %v1320_v25  ;;  %1500 = vmin.xlane.f32.xlu0 %v2483_v58  ;;  %v1478_v25 = vadd.f32 8e-12, %v1470_v44 }
 0x535   :  { %v1404_v43 = vpop.permute.xlu0 %1403  ;;  %v1605_v37 = vmul.f32 %v1597_v16, %v1597_v16 }
 0x536   :  { %v1431_v38 = vsub.f32 %v2450_v42, %v1404_v43  ;;  %v2491_v8 = vpop.permute.xlu1 %1568 }
 0x538   :  { %v1439_v35 = vmul.f32 %v1431_v38, %v1431_v38  ;;  %v1455_v49 = vadd.f32 %v1431_v38, %v1379_v59 }
 0x539   :  { %v1416_v15 = vpop.permute.xlu0 %1415 }
 0x53a   :  { %v1434_v6 = vsub.f32 %v2450_v42, %v1416_v15  ;;  %v2496_v51 = vpop.permute.xlu1 %1578  ;;  %v1447_v39 = vadd.f32 %v1439_v35, %v1387_v31  ;;  %v1463_v60 = vmul.f32 4e-06, %v1455_v49  ;;  %v1598_v31 = vsub.f32 %v2501_v61, %v2491_v8 }
 0x53b   :  { %v1599_v49 = vsub.f32 %v2501_v61, %v2465_v30  ;;  %v1600_v18 = vsub.f32 %v2501_v61, %v2496_v51 }
 0x53c   :  { %v1442_v12 = vmul.f32 %v1434_v6, %v1434_v6  ;;  %v1458_v4 = vadd.f32 %v1434_v6, %v1382_v54  ;;  %1488 = vmin.xlane.f32.xlu1 %v1447_v39  ;;  %v1471_v48 = vsub.f32 %v1447_v39, %v1463_v60 }
 0x53d   :  { %v1424_v0 = vpop.permute.xlu0 %1423  ;;  %v1607_v22 = vmul.f32 %v1599_v49, %v1599_v49 }
 0x53e   :  { %v1466_v26 = vmul.f32 4e-06, %v1458_v4  ;;  %v1436_v13 = vsub.f32 %v2450_v42, %v1424_v0  ;;  %v1589_v19 = vpop.permute.xlu1 %1588  ;;  %v1450_v32 = vadd.f32 %v1442_v12, %v1390_v24  ;;  %v1477_v42 = vsub.f32 %v2483_v58, %v1469_v47 }
 0x53f   :  { %v1479_v57 = vadd.f32 8e-12, %v1471_v48  ;;  %v1601_v24 = vsub.f32 %v2501_v61, %v2473_v11  ;;  %v1606_v4 = vmul.f32 %v1598_v31, %v1598_v31  ;;  %v1602_v34 = vsub.f32 %v2501_v61, %v1589_v19 }
 0x540   :  { %v1444_v2 = vmul.f32 %v1436_v13, %v1436_v13  ;;  %v1460_v21 = vadd.f32 %v1436_v13, %v1384_v1  ;;  %1494 = vmin.xlane.f32.xlu1 %v1450_v32  ;;  %v1474_v27 = vsub.f32 %v1450_v32, %v1466_v26  ;;  %v1485_v58 = vadd.f32 8e-12, %v1477_v42 }
 0x541   :  { %v1622_v36 = vpop.permute.xlu0 %1621  ;;  %v1516_v1 = vmin.f32 %v1479_v57, %v1483_v14  ;;  %v1609_v63 = vmul.f32 %v1601_v24, %v1601_v24  ;;  %v1610_v53 = vmul.f32 %v1602_v34, %v1602_v34 }
 0x542   :  { %v1468_v3 = vmul.f32 4e-06, %v1460_v21  ;;  %v1649_v40 = vsub.f32 %v2504_v10, %v1622_v36  ;;  %v1452_v20 = vadd.f32 %v1444_v2, %v1392_v28  ;;  %v1482_v29 = vadd.f32 8e-12, %v1474_v27 }
 0x543   :  { %v1618_v7 = vpop.permute.xlu1 %1617  ;;  %v1518_v39 = vmin.f32 %v1481_v62, %v1485_v58  ;;  %v1603_v2 = vsub.f32 %v2501_v61, %v2479_v45  ;;  %v1608_v21 = vmul.f32 %v1600_v18, %v1600_v18 }
 0x544   :  { %v1657_v59 = vmul.f32 %v1649_v40, %v1649_v40  ;;  %v1648_v46 = vsub.f32 %v2504_v10, %v1618_v7  ;;  %1498 = vmin.xlane.f32.xlu1 %v1452_v20  ;;  %v1476_v43 = vsub.f32 %v1452_v20, %v1468_v3  ;;  %v1515_v41 = vmin.f32 %v1478_v25, %v1482_v29 }
 0x545   :  { %v1634_v38 = vpop.permute.xlu0 %1633  ;;  %v1673_v26 = vadd.f32 %v1649_v40, %v1597_v16 }
 0x546   :  { %v1656_v54 = vmul.f32 %v1648_v46, %v1648_v46  ;;  %v1484_v35 = vadd.f32 8e-12, %v1476_v43  ;;  %v2523_v50 = vadd.f32 %v1657_v59, %v1605_v37  ;;  %v1652_v15 = vsub.f32 %v2504_v10, %v1634_v38 }
 0x547   :  { %v1626_v56 = vpop.permute.xlu1 %1625  ;;  %v1519_v47 = vmin.f32 %v1515_v41, %v1516_v1  ;;  %v1672_v19 = vadd.f32 %v1648_v46, %v2509_v33  ;;  %v1681_v36 = vmul.f32 4e-06, %v1673_v26 }
 0x548   :  { %v1650_v23 = vsub.f32 %v2504_v10, %v1626_v56  ;;  %v2529_v6 = vadd.f32 %v1656_v54, %v1604_v9  ;;  %v1517_v5 = vmin.f32 %v1480_v55, %v1484_v35  ;;  %1706 = vmin.xlane.f32.xlu0 %v2523_v50  ;;  %v1660_v13 = vmul.f32 %v1652_v15, %v1652_v15 }
 0x549   :  { %v1642_v8 = vpop.permute.xlu0 %1641  ;;  %v1676_v32 = vadd.f32 %v1652_v15, %v1600_v18  ;;  %v1680_v37 = vmul.f32 4e-06, %v1672_v19  ;;  %v1611_v55 = vmul.f32 %v1603_v2, %v1603_v2  ;;  %v1689_v62 = vsub.f32 %v2523_v50, %v1681_v36 }
 0x54a   :  { %v1658_v12 = vmul.f32 %v1650_v23, %v1650_v23  ;;  %v1654_v30 = vsub.f32 %v2504_v10, %v1642_v8  ;;  %1704 = vmin.xlane.f32.xlu1 %v2529_v6  ;;  %v1520_v60 = vmin.f32 %v1517_v5, %v1518_v39  ;;  %v1674_v42 = vadd.f32 %v1650_v23, %v1598_v31 }
 0x54b   :  { %v1630_v0 = vpop.permute.xlu1 %1629  ;;  %v1684_v20 = vmul.f32 4e-06, %v1676_v32  ;;  %v1668_v7 = vadd.f32 %v1660_v13, %v1608_v21 }
 0x54c   :  { %v1678_v28 = vadd.f32 %v1654_v30, %v1602_v34  ;;  %v1651_v11 = vsub.f32 %v2504_v10, %v1630_v0  ;;  %v1666_v44 = vadd.f32 %v1658_v12, %v1606_v4  ;;  %v1521_v51 = vmin.f32 %v1519_v47, %v1520_v60 }
 0x54d   :  { %v1662_v27 = vmul.f32 %v1654_v30, %v1654_v30  ;;  %v1682_v58 = vmul.f32 4e-06, %v1674_v42  ;;  %v1692_v14 = vsub.f32 %v1668_v7, %v1684_v20 }
 0x54e   :  { %v1659_v48 = vmul.f32 %v1651_v11, %v1651_v11  ;;  %1708 = vmin.xlane.f32.xlu1 %v1666_v44  ;;  %v1675_v17 = vadd.f32 %v1651_v11, %v1599_v49  ;;  %v1522_v40 = vrot.slane %v1521_v51, 4  ;;  %v1686_v29 = vmul.f32 4e-06, %v1678_v28 }
 0x54f   :  { %v1638_v16 = vpop.permute.xlu1 %1637  ;;  %v1670_v61 = vadd.f32 %v1662_v27, %v1610_v53  ;;  %v1688_v49 = vsub.f32 %v2529_v6, %v1680_v37  ;;  %v1690_v15 = vsub.f32 %v1666_v44, %v1682_v58  ;;  %v1700_v18 = vadd.f32 8e-12, %v1692_v14 }
 0x550   :  { %v1653_v3 = vsub.f32 %v2504_v10, %v1638_v16  ;;  %v1667_v9 = vadd.f32 %v1659_v48, %v1607_v22  ;;  %v1523_v59 = vmin.f32 %v1521_v51, %v1522_v40  ;;  %v1683_v46 = vmul.f32 4e-06, %v1675_v17 }
 0x551   :  { %v1694_v35 = vsub.f32 %v1670_v61, %v1686_v29  ;;  %v1696_v30 = vadd.f32 8e-12, %v1688_v49  ;;  %v1698_v34 = vadd.f32 8e-12, %v1690_v15 }
 0x552   :  { %v1661_v25 = vmul.f32 %v1653_v3, %v1653_v3  ;;  %v1677_v45 = vadd.f32 %v1653_v3, %v1601_v24  ;;  %1712 = vmin.xlane.f32.xlu1 %v1668_v7  ;;  %1710 = vmin.xlane.f32.xlu0 %v1667_v9  ;;  %v1524_v54 = vrot.slane %v1523_v59, 2  ;;  %v1691_v39 = vsub.f32 %v1667_v9, %v1683_v46 }
 0x553   :  { %v1646_v33 = vpop.permute.xlu1 %1645  ;;  %v1697_v24 = vadd.f32 8e-12, %v1689_v62  ;;  %v1702_v50 = vadd.f32 8e-12, %v1694_v35  ;;  %v1733_v0 = vmin.f32 %v1696_v30, %v1700_v18 }
 0x554   :  { %v1685_v57 = vmul.f32 4e-06, %v1677_v45  ;;  %v1655_v43 = vsub.f32 %v2504_v10, %v1646_v33  ;;  %v1669_v38 = vadd.f32 %v1661_v25, %v1609_v63  ;;  %v1525_v23 = vmin.f32 %v1523_v59, %v1524_v54 }
 0x555   :  { %v1699_v47 = vadd.f32 8e-12, %v1691_v39  ;;  %v1735_v22 = vmin.f32 %v1698_v34, %v1702_v50 }
 0x556   :  { %v1663_v31 = vmul.f32 %v1655_v43, %v1655_v43  ;;  %v1679_v41 = vadd.f32 %v1655_v43, %v1603_v2  ;;  %v1693_v56 = vsub.f32 %v1669_v38, %v1685_v57  ;;  %1716 = vmin.xlane.f32.xlu1 %v1670_v61  ;;  %1714 = vmin.xlane.f32.xlu0 %v1669_v38  ;;  %v1526_v8 = vrot.slane %v1525_v23, 1 }
 0x558   :  { %v1687_v1 = vmul.f32 4e-06, %v1679_v41  ;;  %v1701_v5 = vadd.f32 8e-12, %v1693_v56  ;;  %v1671_v10 = vadd.f32 %v1663_v31, %v1611_v55  ;;  %v1527_v4 = vmin.f32 %v1525_v23, %v1526_v8 }
 0x55a   :  { %v1695_v12 = vsub.f32 %v1671_v10, %v1687_v1  ;;  %1718 = vmin.xlane.f32.xlu0 %v1671_v10  ;;  %v1734_v60 = vmin.f32 %v1697_v24, %v1701_v5  ;;  %1528 = vmax.xlane.f32.xlu1 %v1527_v4 }
 0x55c   :  { %v1703_v6 = vadd.f32 8e-12, %v1695_v12  ;;  %v1737_v13 = vmin.f32 %v1733_v0, %v1734_v60 }
 0x55e   :  { %v1736_v26 = vmin.f32 %v1699_v47, %v1703_v6 }
 0x560   :  { %v1738_v32 = vmin.f32 %v1735_v22, %v1736_v26 }
 0x562   :  { %v1739_v28 = vmin.f32 %v1737_v13, %v1738_v32 }
 0x564   :  { %v1740_v11 = vrot.slane %v1739_v28, 4 }
 0x566   :  { %v1741_v44 = vmin.f32 %v1739_v28, %v1740_v11 }
 0x568   :  { %v1742_v51 = vrot.slane %v1741_v44, 2 }
 0x56a   :  { %v1743_v63 = vmin.f32 %v1741_v44, %v1742_v51 }
 0x56c   :  { %v1744_v2 = vrot.slane %v1743_v63, 1 }
 0x56e   :  { %v1745_v21 = vmin.f32 %v1743_v63, %v1744_v2 }
 0x570   :  { %1746 = vmax.xlane.f32.xlu0 %v1745_v21 }
 0x5b1   :  { %v1487_v27 = vpop.xlane.xlu0 %1486 }
 0x5b5   :  { %v1491_v53 = vpop.xlane.xlu0 %1490 }
 0x5b9   :  { %v1493_v19 = vpop.xlane.xlu0 %1492 }
 0x5bd   :  { %v1497_v42 = vpop.xlane.xlu0 %1496 }
 0x5c1   :  { %v1501_v36 = vpop.xlane.xlu0 %1500 }
 0x5c2   :  { %v1505_v40 = vmax.f32 %v1493_v19, %v1501_v36 }
 0x5c9   :  { %v1489_v48 = vpop.xlane.xlu1 %1488 }
 0x5ca   :  { %v1503_v20 = vmax.f32 %v1489_v48, %v1497_v42 }
 0x5cd   :  { %v1495_v16 = vpop.xlane.xlu1 %1494 }
 0x5ce   :  { %v1502_v17 = vmax.f32 %v1487_v27, %v1495_v16 }
 0x5d0   :  { %v1506_v7 = vmax.f32 %v1502_v17, %v1503_v20 }
 0x5d1   :  { %v1499_v3 = vpop.xlane.xlu1 %1498 }
 0x5d2   :  { %v1504_v29 = vmax.f32 %v1491_v53, %v1499_v3 }
 0x5d4   :  { %v1507_v9 = vmax.f32 %v1504_v29, %v1505_v40 }
 0x5d5   :  { %v1707_v37 = vpop.xlane.xlu0 %1706 }
 0x5d6   :  { %v1508_v25 = vmax.f32 %v1506_v7, %v1507_v9 }
 0x5d7   :  { %v1705_v45 = vpop.xlane.xlu1 %1704 }
 0x5d8   :  { %v1509_v61 = vrot.slane %v1508_v25, 4 }
 0x5da   :  { %v1510_v59 = vmax.f32 %v1508_v25, %v1509_v61 }
 0x5db   :  { %v1709_v58 = vpop.xlane.xlu1 %1708 }
 0x5dc   :  { %v1511_v33 = vrot.slane %v1510_v59, 2 }
 0x5de   :  { %v1512_v43 = vmax.f32 %v1510_v59, %v1511_v33 }
 0x5df   :  { %v1711_v46 = vpop.xlane.xlu0 %1710  ;;  %v1713_v57 = vpop.xlane.xlu1 %1712 }
 0x5e0   :  { %v1513_v62 = vrot.slane %v1512_v43, 1  ;;  %v1720_v31 = vmax.f32 %v1705_v45, %v1713_v57 }
 0x5e2   :  { %v1514_v56 = vmax.f32 %v1512_v43, %v1513_v62 }
 0x5e3   :  { %v1715_v38 = vpop.xlane.xlu0 %1714  ;;  %v1717_v55 = vpop.xlane.xlu1 %1716 }
 0x5e4   :  { %v1721_v14 = vmax.f32 %v1707_v37, %v1715_v38  ;;  %v1722_v41 = vmax.f32 %v1709_v58, %v1717_v55 }
 0x5e6   :  { %v1724_v15 = vmax.f32 %v1720_v31, %v1721_v14 }
 0x5e7   :  { %v1719_v54 = vpop.xlane.xlu0 %1718  ;;  %v1529_v49 = vpop.xlane.xlu1 %1528 }
 0x5e8   :  { %v1723_v35 = vmax.f32 %v1711_v46, %v1719_v54  ;;  %v1530_v39 = vmax.f32 %v1514_v56, %v1529_v49 }
 0x5ea   :  { %v1725_v23 = vmax.f32 %v1722_v41, %v1723_v35  ;;  %1874 = vrsqrt.f32 %v1530_v39  ;;  %vm1533_vm12 = vcmp.eq.f32.partialorder %v1530_v39, inf  ;;  %v1536_v30 = vand.u32 2147483648, %v1530_v39 }
 0x5eb   :  { %vm1535_vm13 = vcmp.eq.f32.partialorder %v1530_v39, 0.0 }
 0x5ec   :  { %v1726_v1 = vmax.f32 %v1724_v15, %v1725_v23 }
 0x5ee   :  { %v1727_v5 = vrot.slane %v1726_v1, 4 }
 0x5f0   :  { %v1728_v10 = vmax.f32 %v1726_v1, %v1727_v5 }
 0x5f2   :  { %v1729_v8 = vrot.slane %v1728_v10, 2 }
 0x5f4   :  { %v1730_v24 = vmax.f32 %v1728_v10, %v1729_v8  ;;  %v1875_v18 = vpop.eup %1874 }
 0x5f5   :  { %v1532_v50 = vmul.f32 %v1875_v18, %v1530_v39 }
 0x5f6   :  { %v1731_v12 = vrot.slane %v1730_v24, 1 }
 0x5f7   :  { %v1534_v4 = vsel %vm1533_vm12, %v1530_v39, %v1532_v50 }
 0x5f8   :  { %v1537_v34 = vsel %vm1535_vm13, %v1536_v30, %v1534_v4  ;;  %v1732_v60 = vmax.f32 %v1730_v24, %v1731_v12 }
 0x5f9   :  { %v1538_v47 = vmul.f32 %v1537_v34, %v2166_v52 }
 0x5fb   :  { %1539 = vst [vmem:[#allocation4 + $0x6] sm:$0x1] %v1538_v47 }
 0x5fd   :  { %v1747_v6 = vpop.xlane.xlu0 %1746 }
 0x5fe   :  { %v1748_v0 = vmax.f32 %v1732_v60, %v1747_v6 }
 0x600   :  { %1876 = vrsqrt.f32 %v1748_v0  ;;  %vm1751_vm14 = vcmp.eq.f32.partialorder %v1748_v0, inf  ;;  %v1754_v13 = vand.u32 2147483648, %v1748_v0  ;;  %vm1753_vm15 = vcmp.eq.f32.partialorder %v1748_v0, 0.0 }
 0x60a   :  { %v1877_v22 = vpop.eup %1876 }
 0x60b   :  { %v1750_v26 = vmul.f32 %v1877_v22, %v1748_v0 }
 0x60d   :  { %v1752_v32 = vsel %vm1751_vm14, %v1748_v0, %v1750_v26 }
 0x60e   :  { %v1755_v28 = vsel %vm1753_vm15, %v1754_v13, %v1752_v32 }
 0x60f   :  { %v1756_v11 = vmul.f32 %v1755_v28, %v2166_v52 }
 0x611   :  { %1757 = vst [vmem:[#allocation4 + $0x7] sm:$0x1] %v1756_v11 }
 0x612   :  { %1889 = shalt.err (!%p1886_p4)
}
 0x613   :  { %s1890_s22 = scalar_lea.hbm %s2564_s3, 128 }
 0x614   :  { %p1891_p5 = scmp.ne.s32.totalorder %s2564_s3, %s1890_s22  ;;  %p1894_p6 = scmp.lt.u32.totalorder %s1890_s22, %s2564_s3 }
 0x616   :  { %p1896_p7 = pnand %p1894_p6, %p1891_p5 }
 0x618   :  { %1899 = shalt.err (!%p1896_p7)
}
 0x619   :  { %1767 = dma.vmem_to_hbm [thread:$0]  %s1765_s18, 128, %s2564_s3, [#allocation5]  }
 0x61a   :  { %1900 = dma.done.wait [#allocation5], 128  }
 0x61b   :  { %1901 = vsyncadd [#allocation5], 4294967168 }
 0x61c   :  { %1771 = vsyncpa [#allocation5], 1 }

</bundles_post_ra>
